<compile_context>
chip_gen: v7x
topology: tpu7x:2x2x1
jax: 0.10.0
libtpu: 0.0.40
codegen_flags: <defaults>
</compile_context>

<pallas_src>
import jax
import jax.numpy as jnp
from jax.experimental import pallas as pl
from jax.experimental.pallas import tpu as pltpu

BN_EPS = 1e-5      # torch BatchNorm1d / PyG BatchNorm default
LANE = 128         # TPU lane width: node count and feature dims are zero-padded to this
NUM_LAYERS = 3


def _round_up(x, m):
    return ((x + m - 1) // m) * m


# --------------------------------------------------------------------------------------
# Fused 3-layer GIN kernel: single invocation, layers unrolled, everything resident in VMEM
# --------------------------------------------------------------------------------------

def fused_gin_kernel(adj_ref, x_ref, w1s_ref, b1s_ref, w2s_ref, b2s_ref, out_ref):
    """adj_ref : (Np, Np)    bf16 dense adjacency with the GIN self-loop folded in (A + I)
       x_ref   : (Np, 128)   bf16 zero-padded input node features
       w1s/w2s : (3,128,128) bf16 per-layer MLP Linear weights with BatchNorms folded in
       b1s/b2s : (3,1,128)   f32  per-layer biases (added after the f32 accumulation)
       out_ref : (Np, 128)   f32  padded output node features
    """
    adj = adj_ref[...]          # stays bf16 -> native MXU rate on the dominant A @ h
    h = x_ref[...]              # bf16

    def layer(h_bf16, l, final_relu):
        # GIN aggregation: (A + I) @ h  (eps = 0, self-term folded into adjacency).
        agg = jnp.dot(adj, h_bf16, preferred_element_type=jnp.float32)
        # MLP hidden Linear (internal BatchNorm folded) + ReLU.
        z = jnp.dot(agg.astype(jnp.bfloat16), w1s_ref[l],
                    preferred_element_type=jnp.float32) + b1s_ref[l]
        z = jnp.maximum(z, 0.0)
        # MLP output Linear (+ folded module-level BatchNorm for layers 0/1).
        z = jnp.dot(z.astype(jnp.bfloat16), w2s_ref[l],
                    preferred_element_type=jnp.float32) + b2s_ref[l]
        if final_relu:
            z = jnp.maximum(z, 0.0)      # module-level ReLU (Dropout is identity in eval)
        return z

    h = layer(h, 0, final_relu=True).astype(jnp.bfloat16)
    h = layer(h, 1, final_relu=True).astype(jnp.bfloat16)
    out_ref[...] = layer(h, 2, final_relu=False)


def fused_gin_pallas(adj, x_pad, w1s, b1s, w2s, b2s):
    n_pad = adj.shape[0]
    F = LANE

    flops = NUM_LAYERS * (2 * n_pad * n_pad * F + 2 * (2 * n_pad * F * F))
    in_bytes = sum(int(a.size) * a.dtype.itemsize for a in (adj, x_pad, w1s, b1s, w2s, b2s))
    out_bytes = n_pad * F * 4

    # Resident VMEM footprint (no grid -> no pipelining, single copy of every operand) plus
    # a few f32 (Np,128) temporaries for agg/z/h. Floor at the 32 MiB default, cap at the
    # v7x physical 64 MiB; beyond that the row-tiled fallback (TODO above) is required.
    footprint = in_bytes + out_bytes + 4 * n_pad * F * 4
    vmem_limit = int(min(max(footprint + (8 << 20), 32 << 20), 64 << 20))

    return pl.pallas_call(
        fused_gin_kernel,
        out_shape=jax.ShapeDtypeStruct((n_pad, F), jnp.float32),
        compiler_params=pltpu.CompilerParams(vmem_limit_bytes=vmem_limit),
        cost_estimate=pl.CostEstimate(flops=flops, transcendentals=0,
                                      bytes_accessed=in_bytes + out_bytes),
    )(adj, x_pad, w1s, b1s, w2s, b2s)


# --------------------------------------------------------------------------------------
# Wrapper-side parameter folding / padding (one-time, plain JAX)
# --------------------------------------------------------------------------------------

def _fold_and_pad_layer(p, apply_outer):
    """Fold BatchNorms (eval running stats) into the Linear weights, pad to 128, cast to
    bf16 (weights only; biases stay f32 and are added after the f32 accumulation)."""
    d_in, d_hidden = p["w1"].shape
    d_out = p["w2"].shape[1]
    assert d_in <= LANE and d_hidden <= LANE and d_out <= LANE, (
        "feature dims > 128 are not supported by the single-tile weight path")

    # MLP-internal BatchNorm1d folded into Linear1.
    s1 = p["mlp_bn_g"] * jax.lax.rsqrt(p["mlp_bn_v"] + BN_EPS)        # (1, d_hidden)
    w1 = p["w1"] * s1
    b1 = (p["b1"] - p["mlp_bn_m"]) * s1 + p["mlp_bn_b"]

    # Module-level BatchNorm (after conv1/conv2) folded into Linear2; conv3 is plain.
    if apply_outer:
        s2 = p["out_bn_g"] * jax.lax.rsqrt(p["out_bn_v"] + BN_EPS)    # (1, d_out)
        w2 = p["w2"] * s2
        b2 = (p["b2"] - p["out_bn_m"]) * s2 + p["out_bn_b"]
    else:
        w2, b2 = p["w2"], p["b2"]

    w1p = jnp.zeros((LANE, LANE), jnp.float32).at[:d_in, :d_hidden].set(w1).astype(jnp.bfloat16)
    b1p = jnp.zeros((1, LANE), jnp.float32).at[:, :d_hidden].set(b1)
    w2p = jnp.zeros((LANE, LANE), jnp.float32).at[:d_hidden, :d_out].set(w2).astype(jnp.bfloat16)
    b2p = jnp.zeros((1, LANE), jnp.float32).at[:, :d_out].set(b2)
    return w1p, b1p, w2p, b2p


def _prepare_fused_params(params):
    assert len(params) == NUM_LAYERS
    outer_flags = (True, True, False)   # conv1/conv2 have BN+ReLU after them, conv3 does not
    folded = [_fold_and_pad_layer(p, o) for p, o in zip(params, outer_flags)]
    w1s = jnp.stack([f[0] for f in folded])   # (3, 128, 128) bf16
    b1s = jnp.stack([f[1] for f in folded])   # (3, 1, 128)   f32
    w2s = jnp.stack([f[2] for f in folded])   # (3, 128, 128) bf16
    b2s = jnp.stack([f[3] for f in folded])   # (3, 1, 128)   f32
    return w1s, b1s, w2s, b2s


def _build_padded_adj(edge_index, num_nodes, n_pad):
    """Dense A[dst, src] += 1 plus the GIN self-loop (eps = 0), zero-padded, cast to bf16.
    Edge counts are small integers, so the bf16 cast is exact as long as the per-(dst,src)
    multiplicity stays <= 256 (true for any reasonable graph)."""
    src, dst = edge_index[0], edge_index[1]
    adj = jnp.zeros((n_pad, n_pad), jnp.float32)
    adj = adj.at[dst, src].add(1.0)
    diag = jnp.arange(num_nodes)
    adj = adj.at[diag, diag].add(1.0)          # (1 + eps) * x_i  with eps = 0
    return adj.astype(jnp.bfloat16)


def three_layer_gin_forward(x, edge_index, params):
    n, d_in = x.shape
    d_out = params[2]["w2"].shape[1]
    n_pad = _round_up(n, LANE)                 # lane-dense adjacency / MXU-shaped matmuls

    adj = _build_padded_adj(edge_index, n, n_pad)
    x_pad = jnp.zeros((n_pad, LANE), jnp.float32).at[:n, :d_in].set(x).astype(jnp.bfloat16)
    w1s, b1s, w2s, b2s = _prepare_fused_params(params)

    out_pad = fused_gin_pallas(adj, x_pad, w1s, b1s, w2s, b2s)
    return out_pad[:n, :d_out]


# --------------------------------------------------------------------------------------
# Synthetic parameters (torch-shaped, unfolded — the reference consumes these directly)
# --------------------------------------------------------------------------------------

def init_layer_params(key, d_in, d_hidden, d_out):
    ks = jax.random.split(key, 8)
    f32 = jnp.float32
    return {
        # MLP Linear 1: d_in -> d_hidden   (stored [in, out] for x @ W)
        "w1": jax.random.normal(ks[0], (d_in, d_hidden), f32) * (1.0 / jnp.sqrt(d_in)),
        "b1": jax.random.normal(ks[1], (1, d_hidden), f32) * 0.05,
        # MLP-internal BatchNorm1d(d_hidden), running stats
        "mlp_bn_g": 1.0 + jax.random.normal(ks[2], (1, d_hidden), f32) * 0.05,
        "mlp_bn_b": jax.random.normal(ks[3], (1, d_hidden), f32) * 0.05,
        "mlp_bn_m": jax.random.normal(ks[4], (1, d_hidden), f32) * 0.05,
        "mlp_bn_v": 1.0 + jax.random.uniform(ks[5], (1, d_hidden), f32) * 0.1,
        # MLP Linear 2: d_hidden -> d_out
        "w2": jax.random.normal(ks[6], (d_hidden, d_out), f32) * (1.0 / jnp.sqrt(d_hidden)),
        "b2": jax.random.normal(ks[7], (1, d_out), f32) * 0.05,
        # Module-level BatchNorm(d_out) (unused for the last layer)
        "out_bn_g": 1.0 + jax.random.normal(jax.random.fold_in(key, 10), (1, d_out), f32) * 0.05,
        "out_bn_b": jax.random.normal(jax.random.fold_in(key, 11), (1, d_out), f32) * 0.05,
        "out_bn_m": jax.random.normal(jax.random.fold_in(key, 12), (1, d_out), f32) * 0.05,
        "out_bn_v": 1.0 + jax.random.uniform(jax.random.fold_in(key, 13), (1, d_out), f32) * 0.1,
    }


# --------------------------------------------------------------------------------------
# Pure-JAX f32 reference (unfolded, unpadded) for verification
# --------------------------------------------------------------------------------------

def edge_index_to_dense_adj(edge_index, num_nodes):
    src, dst = edge_index[0], edge_index[1]
    adj = jnp.zeros((num_nodes, num_nodes), jnp.float32)
    return adj.at[dst, src].add(1.0)


def _ref_bn(z, g, b, m, v):
    return (z - m) * (g * jax.lax.rsqrt(v + BN_EPS)) + b


def _ref_layer(adj, x, p, apply_outer):
    agg = adj @ x + x
    z = agg @ p["w1"] + p["b1"]
    z = jnp.maximum(_ref_bn(z, p["mlp_bn_g"], p["mlp_bn_b"], p["mlp_bn_m"], p["mlp_bn_v"]), 0.0)
    z = z @ p["w2"] + p["b2"]
    if apply_outer:
        z = jnp.maximum(_ref_bn(z, p["out_bn_g"], p["out_bn_b"], p["out_bn_m"], p["out_bn_v"]), 0.0)
    return z


def three_layer_gin_reference(x, edge_index, params):
    adj = edge_index_to_dense_adj(edge_index, x.shape[0])
    h = _ref_layer(adj, x, params[0], True)
    h = _ref_layer(adj, h, params[1], True)
    h = _ref_layer(adj, h, params[2], False)
    return h


if __name__ == "__main__":
    NUM_NODES, NUM_EDGES = 16, 40
    INPUT_DIM, HIDDEN_DIM, OUTPUT_DIM = 8, 32, 16

    key = jax.random.PRNGKey(0)
    k_x, k_e, k_p1, k_p2, k_p3 = jax.random.split(key, 5)

    x = jax.random.normal(k_x, (NUM_NODES, INPUT_DIM), jnp.float32)
    edge_index = jax.random.randint(k_e, (2, NUM_EDGES), 0, NUM_NODES, jnp.int32)

    params = [
        init_layer_params(k_p1, INPUT_DIM, HIDDEN_DIM, HIDDEN_DIM),
        init_layer_params(k_p2, HIDDEN_DIM, HIDDEN_DIM, HIDDEN_DIM),
        init_layer_params(k_p3, HIDDEN_DIM, HIDDEN_DIM, OUTPUT_DIM),
    ]

    out = three_layer_gin_forward(x, edge_index, params)
    out = jax.block_until_ready(out)

    ref = three_layer_gin_reference(x, edge_index, params)
    assert out.shape == (NUM_NODES, OUTPUT_DIM)
    # bf16 MXU inputs with f32 accumulation: compare on a range-normalized max error.
    err = float(jnp.max(jnp.abs(out - ref)) / (jnp.max(jnp.abs(ref)) + 1e-6))
    assert err < 5e-2, f"Pallas output mismatch vs reference (normalized max err {err})"

    print("KERNEL_OK")
</pallas_src>

<mosaic_0001>
module attributes {stable_mosaic.version = 11 : i64} {
  func.func @fused_gin_kernel(%arg0: memref<128x128xbf16, #tpu.memory_space<vmem>>, %arg1: memref<128x128xbf16, #tpu.memory_space<vmem>>, %arg2: memref<3x128x128xbf16, #tpu.memory_space<vmem>>, %arg3: memref<3x1x128xf32, #tpu.memory_space<vmem>>, %arg4: memref<3x128x128xbf16, #tpu.memory_space<vmem>>, %arg5: memref<3x1x128xf32, #tpu.memory_space<vmem>>, %arg6: memref<128x128xf32, #tpu.memory_space<vmem>>) attributes {dimension_semantics = [], scalar_prefetch = 0 : i64, scratch_operands = 0 : i64, tpu.core_type = #tpu.core_type<tc>} {
    %c0 = arith.constant 0 : index
    %c0_0 = arith.constant 0 : index
    %0 = vector.load %arg0[%c0, %c0_0] : memref<128x128xbf16, #tpu.memory_space<vmem>>, vector<128x128xbf16>
    %c0_1 = arith.constant 0 : index
    %c0_2 = arith.constant 0 : index
    %1 = vector.load %arg1[%c0_1, %c0_2] : memref<128x128xbf16, #tpu.memory_space<vmem>>, vector<128x128xbf16>
    %cst = arith.constant dense<0.000000e+00> : vector<128x128xf32>
    %2 = tpu.matmul %0, %1, %cst {dimension_numbers = #tpu.dot_dimension_numbers<[1], [0], [0], [1], [0, 0, 1, 1], [], []>} : vector<128x128xbf16>, vector<128x128xbf16>, vector<128x128xf32> -> vector<128x128xf32>
    %3 = arith.truncf %2 : vector<128x128xf32> to vector<128x128xbf16>
    %c0_3 = arith.constant 0 : index
    %c0_4 = arith.constant 0 : index
    %c0_5 = arith.constant 0 : index
    %4 = vector.load %arg2[%c0_3, %c0_4, %c0_5] : memref<3x128x128xbf16, #tpu.memory_space<vmem>>, vector<1x128x128xbf16>
    %5 = vector.shape_cast %4 : vector<1x128x128xbf16> to vector<128x128xbf16>
    %cst_6 = arith.constant dense<0.000000e+00> : vector<128x128xf32>
    %6 = tpu.matmul %3, %5, %cst_6 {dimension_numbers = #tpu.dot_dimension_numbers<[1], [0], [0], [1], [0, 0, 1, 1], [], []>} : vector<128x128xbf16>, vector<128x128xbf16>, vector<128x128xf32> -> vector<128x128xf32>
    %c0_7 = arith.constant 0 : index
    %c0_8 = arith.constant 0 : index
    %c0_9 = arith.constant 0 : index
    %7 = vector.load %arg3[%c0_7, %c0_8, %c0_9] : memref<3x1x128xf32, #tpu.memory_space<vmem>>, vector<1x1x128xf32>
    %8 = vector.shape_cast %7 : vector<1x1x128xf32> to vector<1x128xf32>
    %9 = vector.broadcast %8 : vector<1x128xf32> to vector<128x128xf32>
    %10 = arith.addf %6, %9 : vector<128x128xf32>
    %cst_10 = arith.constant 0.000000e+00 : f32
    %11 = vector.broadcast %cst_10 : f32 to vector<128x128xf32>
    %12 = arith.maximumf %10, %11 : vector<128x128xf32>
    %13 = arith.truncf %12 : vector<128x128xf32> to vector<128x128xbf16>
    %c0_11 = arith.constant 0 : index
    %c0_12 = arith.constant 0 : index
    %c0_13 = arith.constant 0 : index
    %14 = vector.load %arg4[%c0_11, %c0_12, %c0_13] : memref<3x128x128xbf16, #tpu.memory_space<vmem>>, vector<1x128x128xbf16>
    %15 = vector.shape_cast %14 : vector<1x128x128xbf16> to vector<128x128xbf16>
    %cst_14 = arith.constant dense<0.000000e+00> : vector<128x128xf32>
    %16 = tpu.matmul %13, %15, %cst_14 {dimension_numbers = #tpu.dot_dimension_numbers<[1], [0], [0], [1], [0, 0, 1, 1], [], []>} : vector<128x128xbf16>, vector<128x128xbf16>, vector<128x128xf32> -> vector<128x128xf32>
    %c0_15 = arith.constant 0 : index
    %c0_16 = arith.constant 0 : index
    %c0_17 = arith.constant 0 : index
    %17 = vector.load %arg5[%c0_15, %c0_16, %c0_17] : memref<3x1x128xf32, #tpu.memory_space<vmem>>, vector<1x1x128xf32>
    %18 = vector.shape_cast %17 : vector<1x1x128xf32> to vector<1x128xf32>
    %19 = vector.broadcast %18 : vector<1x128xf32> to vector<128x128xf32>
    %20 = arith.addf %16, %19 : vector<128x128xf32>
    %cst_18 = arith.constant 0.000000e+00 : f32
    %21 = vector.broadcast %cst_18 : f32 to vector<128x128xf32>
    %22 = arith.maximumf %20, %21 : vector<128x128xf32>
    %23 = arith.truncf %22 : vector<128x128xf32> to vector<128x128xbf16>
    %cst_19 = arith.constant dense<0.000000e+00> : vector<128x128xf32>
    %24 = tpu.matmul %0, %23, %cst_19 {dimension_numbers = #tpu.dot_dimension_numbers<[1], [0], [0], [1], [0, 0, 1, 1], [], []>} : vector<128x128xbf16>, vector<128x128xbf16>, vector<128x128xf32> -> vector<128x128xf32>
    %25 = arith.truncf %24 : vector<128x128xf32> to vector<128x128xbf16>
    %c1 = arith.constant 1 : index
    %c0_20 = arith.constant 0 : index
    %c0_21 = arith.constant 0 : index
    %26 = vector.load %arg2[%c1, %c0_20, %c0_21] : memref<3x128x128xbf16, #tpu.memory_space<vmem>>, vector<1x128x128xbf16>
    %27 = vector.shape_cast %26 : vector<1x128x128xbf16> to vector<128x128xbf16>
    %cst_22 = arith.constant dense<0.000000e+00> : vector<128x128xf32>
    %28 = tpu.matmul %25, %27, %cst_22 {dimension_numbers = #tpu.dot_dimension_numbers<[1], [0], [0], [1], [0, 0, 1, 1], [], []>} : vector<128x128xbf16>, vector<128x128xbf16>, vector<128x128xf32> -> vector<128x128xf32>
    %c1_23 = arith.constant 1 : index
    %c0_24 = arith.constant 0 : index
    %c0_25 = arith.constant 0 : index
    %29 = vector.load %arg3[%c1_23, %c0_24, %c0_25] : memref<3x1x128xf32, #tpu.memory_space<vmem>>, vector<1x1x128xf32>
    %30 = vector.shape_cast %29 : vector<1x1x128xf32> to vector<1x128xf32>
    %31 = vector.broadcast %30 : vector<1x128xf32> to vector<128x128xf32>
    %32 = arith.addf %28, %31 : vector<128x128xf32>
    %cst_26 = arith.constant 0.000000e+00 : f32
    %33 = vector.broadcast %cst_26 : f32 to vector<128x128xf32>
    %34 = arith.maximumf %32, %33 : vector<128x128xf32>
    %35 = arith.truncf %34 : vector<128x128xf32> to vector<128x128xbf16>
    %c1_27 = arith.constant 1 : index
    %c0_28 = arith.constant 0 : index
    %c0_29 = arith.constant 0 : index
    %36 = vector.load %arg4[%c1_27, %c0_28, %c0_29] : memref<3x128x128xbf16, #tpu.memory_space<vmem>>, vector<1x128x128xbf16>
    %37 = vector.shape_cast %36 : vector<1x128x128xbf16> to vector<128x128xbf16>
    %cst_30 = arith.constant dense<0.000000e+00> : vector<128x128xf32>
    %38 = tpu.matmul %35, %37, %cst_30 {dimension_numbers = #tpu.dot_dimension_numbers<[1], [0], [0], [1], [0, 0, 1, 1], [], []>} : vector<128x128xbf16>, vector<128x128xbf16>, vector<128x128xf32> -> vector<128x128xf32>
    %c1_31 = arith.constant 1 : index
    %c0_32 = arith.constant 0 : index
    %c0_33 = arith.constant 0 : index
    %39 = vector.load %arg5[%c1_31, %c0_32, %c0_33] : memref<3x1x128xf32, #tpu.memory_space<vmem>>, vector<1x1x128xf32>
    %40 = vector.shape_cast %39 : vector<1x1x128xf32> to vector<1x128xf32>
    %41 = vector.broadcast %40 : vector<1x128xf32> to vector<128x128xf32>
    %42 = arith.addf %38, %41 : vector<128x128xf32>
    %cst_34 = arith.constant 0.000000e+00 : f32
    %43 = vector.broadcast %cst_34 : f32 to vector<128x128xf32>
    %44 = arith.maximumf %42, %43 : vector<128x128xf32>
    %45 = arith.truncf %44 : vector<128x128xf32> to vector<128x128xbf16>
    %cst_35 = arith.constant dense<0.000000e+00> : vector<128x128xf32>
    %46 = tpu.matmul %0, %45, %cst_35 {dimension_numbers = #tpu.dot_dimension_numbers<[1], [0], [0], [1], [0, 0, 1, 1], [], []>} : vector<128x128xbf16>, vector<128x128xbf16>, vector<128x128xf32> -> vector<128x128xf32>
    %47 = arith.truncf %46 : vector<128x128xf32> to vector<128x128xbf16>
    %c2 = arith.constant 2 : index
    %c0_36 = arith.constant 0 : index
    %c0_37 = arith.constant 0 : index
    %48 = vector.load %arg2[%c2, %c0_36, %c0_37] : memref<3x128x128xbf16, #tpu.memory_space<vmem>>, vector<1x128x128xbf16>
    %49 = vector.shape_cast %48 : vector<1x128x128xbf16> to vector<128x128xbf16>
    %cst_38 = arith.constant dense<0.000000e+00> : vector<128x128xf32>
    %50 = tpu.matmul %47, %49, %cst_38 {dimension_numbers = #tpu.dot_dimension_numbers<[1], [0], [0], [1], [0, 0, 1, 1], [], []>} : vector<128x128xbf16>, vector<128x128xbf16>, vector<128x128xf32> -> vector<128x128xf32>
    %c2_39 = arith.constant 2 : index
    %c0_40 = arith.constant 0 : index
    %c0_41 = arith.constant 0 : index
    %51 = vector.load %arg3[%c2_39, %c0_40, %c0_41] : memref<3x1x128xf32, #tpu.memory_space<vmem>>, vector<1x1x128xf32>
    %52 = vector.shape_cast %51 : vector<1x1x128xf32> to vector<1x128xf32>
    %53 = vector.broadcast %52 : vector<1x128xf32> to vector<128x128xf32>
    %54 = arith.addf %50, %53 : vector<128x128xf32>
    %cst_42 = arith.constant 0.000000e+00 : f32
    %55 = vector.broadcast %cst_42 : f32 to vector<128x128xf32>
    %56 = arith.maximumf %54, %55 : vector<128x128xf32>
    %57 = arith.truncf %56 : vector<128x128xf32> to vector<128x128xbf16>
    %c2_43 = arith.constant 2 : index
    %c0_44 = arith.constant 0 : index
    %c0_45 = arith.constant 0 : index
    %58 = vector.load %arg4[%c2_43, %c0_44, %c0_45] : memref<3x128x128xbf16, #tpu.memory_space<vmem>>, vector<1x128x128xbf16>
    %59 = vector.shape_cast %58 : vector<1x128x128xbf16> to vector<128x128xbf16>
    %cst_46 = arith.constant dense<0.000000e+00> : vector<128x128xf32>
    %60 = tpu.matmul %57, %59, %cst_46 {dimension_numbers = #tpu.dot_dimension_numbers<[1], [0], [0], [1], [0, 0, 1, 1], [], []>} : vector<128x128xbf16>, vector<128x128xbf16>, vector<128x128xf32> -> vector<128x128xf32>
    %c2_47 = arith.constant 2 : index
    %c0_48 = arith.constant 0 : index
    %c0_49 = arith.constant 0 : index
    %61 = vector.load %arg5[%c2_47, %c0_48, %c0_49] : memref<3x1x128xf32, #tpu.memory_space<vmem>>, vector<1x1x128xf32>
    %62 = vector.shape_cast %61 : vector<1x1x128xf32> to vector<1x128xf32>
    %63 = vector.broadcast %62 : vector<1x128xf32> to vector<128x128xf32>
    %64 = arith.addf %60, %63 : vector<128x128xf32>
    %c0_50 = arith.constant 0 : index
    %c0_51 = arith.constant 0 : index
    %65 = vector.load %arg6[%c0_50, %c0_51] : memref<128x128xf32, #tpu.memory_space<vmem>>, vector<128x128xf32>
    tpu.vector_store %arg6[%c0_50, %c0_51], %64 {strides = array<i32>} : memref<128x128xf32, #tpu.memory_space<vmem>>, vector<128x128xf32>,
    return
  }
}

</mosaic_0001>

<bundles_post_ra>
// kernel: tpu_custom_call.1
= control target key start
LH: loop header
LB: loop body
LE: loop exit
PB: predicated region body
PF: predicated region fallthrough
CT: control target
= control target key end

     0   :  { %11 = vsyncpa [#allocation3], 0  ;;  %s2595_s0 = inlined_call_operand.hbm [shape: bf16[128,128], index: 0, kind: input, shape index: {}]   ;;  %s2596_s1 = inlined_call_operand.hbm [shape: bf16[128,128], index: 1, kind: input, shape index: {}]   ;;  %s2597_s2 = inlined_call_operand.hbm [shape: bf16[3,128,128], index: 2, kind: input, shape index: {}]   ;;  %s2598_s3 = inlined_call_operand.vmem [shape: f32[3,1,128], index: 3, kind: input, shape index: {}]   ;;  %s2599_s4 = inlined_call_operand.hbm [shape: bf16[3,128,128], index: 4, kind: input, shape index: {}]   ;;  %s2600_s5 = inlined_call_operand.vmem [shape: f32[3,1,128], index: 5, kind: input, shape index: {}]   ;;  %s2601_s6 = inlined_call_operand.hbm [shape: f32[128,128], index: 6, kind: output, shape index: {}]  }
   0x1   :  { %12 = vsyncpa [#allocation6], 0 }
   0x2   :  { %13 = vsyncpa [#allocation9], 0 }
   0x3   :  { %14 = vsyncpa [#allocation4], 0  ;;  %s2409_s21 = smov [#allocation5]   ;;  %s2410_s23 = smov [#allocation2]  }
   0x4   :  { %s32_s22 = sshll.u32 %s2409_s21, 4  ;;  %s20_s24 = sshll.u32 %s2410_s23, 4  ;;  %s33_s22 = int_to_ptr.vmem [resolvable:$true] %s32_s22  ;;  %s2453_s24 = int_to_ptr.vmem [resolvable:$true] %s20_s24 }
   0x5   :  { %s2291_s27 = scalar_lea.hbm %s2596_s1, 1024 }
   0x6   :  { %p2292_p0 = scmp.ne.s32.totalorder %s2596_s1, %s2291_s27  ;;  %p2295_p1 = scmp.lt.u32.totalorder %s2291_s27, %s2596_s1 }
   0x8   :  { %p2297_p2 = pnand %p2295_p1, %p2292_p0 }
   0xa   :  { %2300 = shalt.err (!%p2297_p2)
}
   0xb   :  { %s2301_s8 = scalar_lea.vmem %s33_s22, 1024  ;;  %p2306_p4 = scmp.lt.s32.totalorder %s33_s22, %s33_s22 }
   0xc   :  { %p2302_p3 = scmp.ne.s32.totalorder %s33_s22, %s2301_s8  ;;  %p2307_p5 = scmp.lt.s32.totalorder %s2301_s8, %s2301_s8 }
   0xe   :  { %p2308_p6 = por %p2307_p5, %p2306_p4 }
  0x10   :  { %p2309_p7 = pnand %p2308_p6, %p2302_p3 }
  0x12   :  { %2312 = shalt.err (!%p2309_p7)
}
  0x13   :  { %s2411_s9 = smov 64   ;;  %s2412_s10 = smov 4  }
  0x14   :  { %38 = dma.hbm_to_vmem [thread:$0]  %s2596_s1, 1024, %s33_s22, [#allocation6], %s2411_s9, %s2411_s9, %s2412_s10  }
  0x15   :  { %s2313_s15 = scalar_lea.hbm %s2595_s0, 1024 }
  0x16   :  { %p2314_p8 = scmp.ne.s32.totalorder %s2595_s0, %s2313_s15  ;;  %p2317_p9 = scmp.lt.u32.totalorder %s2313_s15, %s2595_s0 }
  0x18   :  { %p2319_p10 = pnand %p2317_p9, %p2314_p8 }
  0x1a   :  { %2322 = shalt.err (!%p2319_p10)
}
  0x1b   :  { %s2323_s20 = scalar_lea.vmem %s2453_s24, 1024  ;;  %p2328_p12 = scmp.lt.s32.totalorder %s2453_s24, %s2453_s24 }
  0x1c   :  { %p2324_p11 = scmp.ne.s32.totalorder %s2453_s24, %s2323_s20  ;;  %p2329_p13 = scmp.lt.s32.totalorder %s2323_s20, %s2323_s20 }
  0x1e   :  { %p2330_p0 = por %p2329_p13, %p2328_p12 }
  0x20   :  { %p2331_p1 = pnand %p2330_p0, %p2324_p11 }
  0x22   :  { %2334 = shalt.err (!%p2331_p1)
}
  0x23   :  { %26 = dma.hbm_to_vmem [thread:$0]  %s2595_s0, 1024, %s2453_s24, [#allocation3], %s2411_s9, %s2411_s9, %s2412_s10  }
  0x24   :  { %s2413_s22 = smov [#allocation7]   ;;  %s2414_s25 = smov [#allocation8]  }
  0x25   :  { %s44_s23 = sshll.u32 %s2413_s22, 4  ;;  %s58_s26 = sshll.u32 %s2414_s25, 4  ;;  %s45_s23 = int_to_ptr.vmem [resolvable:$true] %s44_s23  ;;  %s2490_s26 = int_to_ptr.vmem [resolvable:$true] %s58_s26 }
  0x26   :  { %s2335_s29 = scalar_lea.hbm %s2597_s2, 3072 }
  0x27   :  { %p2336_p2 = scmp.ne.s32.totalorder %s2597_s2, %s2335_s29  ;;  %p2339_p3 = scmp.lt.u32.totalorder %s2335_s29, %s2597_s2 }
  0x29   :  { %p2341_p4 = pnand %p2339_p3, %p2336_p2 }
  0x2b   :  { %2344 = shalt.err (!%p2341_p4)
}
  0x2c   :  { %s2345_s0 = scalar_lea.vmem %s45_s23, 3072  ;;  %p2350_p6 = scmp.lt.s32.totalorder %s45_s23, %s45_s23 }
  0x2d   :  { %p2346_p5 = scmp.ne.s32.totalorder %s45_s23, %s2345_s0  ;;  %p2351_p7 = scmp.lt.s32.totalorder %s2345_s0, %s2345_s0 }
  0x2f   :  { %p2352_p8 = por %p2351_p7, %p2350_p6 }
  0x31   :  { %p2353_p9 = pnand %p2352_p8, %p2346_p5 }
  0x33   :  { %2356 = shalt.err (!%p2353_p9)
}
  0x34   :  { %50 = dma.hbm_to_vmem [thread:$0]  %s2597_s2, 3072, %s45_s23, [#allocation6], %s2411_s9, %s2411_s9, %s2412_s10  }
  0x35   :  { %s2357_s15 = scalar_lea.hbm %s2599_s4, 3072 }
  0x36   :  { %p2358_p10 = scmp.ne.s32.totalorder %s2599_s4, %s2357_s15  ;;  %p2361_p11 = scmp.lt.u32.totalorder %s2357_s15, %s2599_s4 }
  0x38   :  { %p2363_p12 = pnand %p2361_p11, %p2358_p10 }
  0x3a   :  { %2366 = shalt.err (!%p2363_p12)
}
  0x3b   :  { %s2367_s20 = scalar_lea.vmem %s2490_s26, 3072  ;;  %p2372_p0 = scmp.lt.s32.totalorder %s2490_s26, %s2490_s26 }
  0x3c   :  { %p2368_p13 = scmp.ne.s32.totalorder %s2490_s26, %s2367_s20  ;;  %p2373_p1 = scmp.lt.s32.totalorder %s2367_s20, %s2367_s20 }
  0x3e   :  { %p2374_p2 = por %p2373_p1, %p2372_p0 }
  0x40   :  { %p2375_p3 = pnand %p2374_p2, %p2368_p13 }
  0x42   :  { %2378 = shalt.err (!%p2375_p3)
}
  0x43   :  { %64 = dma.hbm_to_vmem [thread:$0]  %s2599_s4, 3072, %s2490_s26, [#allocation9], %s2411_s9, %s2411_s9, %s2412_s10  }
  0x44   :  { %2401 = dma.done.wait [#allocation3], 1024  }
  0x45   :  { %2402 = vsyncadd [#allocation3], 4294966272 }
  0x46   :  { %2403 = dma.done.wait [#allocation6], 4096  }
  0x47   :  { %2404 = vsyncadd [#allocation6], 4294963200 }
  0x48   :  { %2405 = dma.done.wait [#allocation9], 3072  }
  0x49   :  { %2406 = vsyncadd [#allocation9], 4294964224  ;;  %v2225_v0 = vld [vmem:[#allocation5] sm:$0xff]   ;;  %v2226_v1 = vld [vmem:[#allocation5 + $0x8] sm:$0xff]  }
  0x4a   :  { %1912 = vmatprep.subr.bf16.mxu0 %v2225_v0  ;;  %v2227_v2 = vld [vmem:[#allocation5 + $0x10] sm:$0xff]   ;;  %v2228_v3 = vld [vmem:[#allocation5 + $0x18] sm:$0xff]   ;;  %v2527_v4 = vld [vmem:[#allocation2] sm:$0xff]  }
  0x4b   :  { %1913 = vmatpush3.bf16.msra.mxu0 %v2225_v0  ;;  %1928 = vmatprep.mubr.bf16.mxu0 %v2527_v4  ;;  %v2229_v5 = vld [vmem:[#allocation5 + $0x20] sm:$0xff]   ;;  %v2230_v6 = vld [vmem:[#allocation5 + $0x28] sm:$0xff]   ;;  %v2231_v9 = vld [vmem:[#allocation5 + $0x30] sm:$0xff]  }
  0x4c   :  { %1914 = vmatprep.subr.bf16.mxu0 %v2226_v1  ;;  %v2241_v7 = vld [vmem:[#allocation7] sm:$0xff]   ;;  %v2242_v8 = vld [vmem:[#allocation7 + $0x8] sm:$0xff]   ;;  %v2243_v10 = vld [vmem:[#allocation7 + $0x10] sm:$0xff]  }
  0x4d   :  { %1944 = vmatprep.subr.bf16.mxu1 %v2241_v7  ;;  %v2232_v11 = vld [vmem:[#allocation5 + $0x38] sm:$0xff]   ;;  %v2245_v13 = vld [vmem:[#allocation7 + $0x20] sm:$0xff]   ;;  %v2530_v14 = vld [vmem:[#allocation2 + $0x8] sm:$0xff]  }
  0x4e   :  { %1945 = vmatpush3.bf16.msra.mxu1 %v2241_v7  ;;  %v2244_v12 = vld [vmem:[#allocation7 + $0x18] sm:$0xff]   ;;  %v2532_v15 = vld [vmem:[#allocation2 + $0x10] sm:$0xff]   ;;  %v2246_v16 = vld [vmem:[#allocation7 + $0x28] sm:$0xff]  }
  0x4f   :  { %1915 = vmatpush3.bf16.msra.mxu0 %v2226_v1  ;;  %1946 = vmatprep.subr.bf16.mxu1 %v2242_v8  ;;  %v2247_v17 = vld [vmem:[#allocation7 + $0x30] sm:$0xff]   ;;  %v2536_v18 = vld [vmem:[#allocation2 + $0x18] sm:$0xff]   ;;  %v2538_v19 = vld [vmem:[#allocation2 + $0x20] sm:$0xff]  }
  0x50   :  { %1916 = vmatprep.subr.bf16.mxu0 %v2227_v2  ;;  %v2542_v20 = vld [vmem:[#allocation2 + $0x28] sm:$0xff]   ;;  %v2544_v21 = vld [vmem:[#allocation2 + $0x30] sm:$0xff]   ;;  %v2548_v22 = vld [vmem:[#allocation2 + $0x38] sm:$0xff]  }
  0x51   :  { %v2248_v23 = vld [vmem:[#allocation7 + $0x38] sm:$0xff]   ;;  %v2249_v24 = vld [vmem:[#allocation8] sm:$0xff]   ;;  %v2250_v25 = vld [vmem:[#allocation8 + $0x8] sm:$0xff]  }
  0x52   :  { %1947 = vmatpush3.bf16.msra.mxu1 %v2242_v8  ;;  %v2251_v26 = vld [vmem:[#allocation8 + $0x10] sm:$0xff]   ;;  %v2252_v27 = vld [vmem:[#allocation8 + $0x18] sm:$0xff]   ;;  %v2253_v28 = vld [vmem:[#allocation8 + $0x20] sm:$0xff]  }
  0x53   :  { %1917 = vmatpush3.bf16.msra.mxu0 %v2227_v2  ;;  %1948 = vmatprep.subr.bf16.mxu1 %v2243_v10  ;;  %v2254_v29 = vld [vmem:[#allocation8 + $0x28] sm:$0xff]   ;;  %v2255_v54 = vld [vmem:[#allocation8 + $0x30] sm:$0xff]   ;;  %v2256_v55 = vld [vmem:[#allocation8 + $0x38] sm:$0xff]  }
  0x54   :  { %1918 = vmatprep.subr.bf16.mxu0 %v2228_v3  ;;  %v1710_v56 = vld [vmem:[%s2598_s3] ss:$0 sm:$0xff] }
  0x56   :  { %1949 = vmatpush3.bf16.msra.mxu1 %v2243_v10 }
  0x57   :  { %1919 = vmatpush3.bf16.msra.mxu0 %v2228_v3  ;;  %1950 = vmatprep.subr.bf16.mxu1 %v2244_v12 }
  0x58   :  { %1920 = vmatprep.subr.bf16.mxu0 %v2229_v5 }
  0x5a   :  { %1951 = vmatpush3.bf16.msra.mxu1 %v2244_v12 }
  0x5b   :  { %1921 = vmatpush3.bf16.msra.mxu0 %v2229_v5  ;;  %1952 = vmatprep.subr.bf16.mxu1 %v2245_v13 }
  0x5c   :  { %1922 = vmatprep.subr.bf16.mxu0 %v2230_v6 }
  0x5e   :  { %1953 = vmatpush3.bf16.msra.mxu1 %v2245_v13 }
  0x5f   :  { %1923 = vmatpush3.bf16.msra.mxu0 %v2230_v6  ;;  %1954 = vmatprep.subr.bf16.mxu1 %v2246_v16 }
  0x60   :  { %1924 = vmatprep.subr.bf16.mxu0 %v2231_v9 }
  0x62   :  { %1955 = vmatpush3.bf16.msra.mxu1 %v2246_v16 }
  0x63   :  { %1925 = vmatpush3.bf16.msra.mxu0 %v2231_v9  ;;  %1956 = vmatprep.subr.bf16.mxu1 %v2247_v17 }
  0x64   :  { %1926 = vmatprep.subr.bf16.mxu0 %v2232_v11 }
  0x66   :  { %1957 = vmatpush3.bf16.msra.mxu1 %v2247_v17 }
  0x67   :  { %1927 = vmatpush3.bf16.msra.mxu0 %v2232_v11  ;;  %1958 = vmatprep.subr.bf16.mxu1 %v2248_v23 }
  0x68   :  { %1976 = vmatprep.subr.bf16.mxu0 %v2249_v24 }
  0x6a   :  { %1929 = vmatmul.mubr.bf16.vlgmr.msra.gmra.mrb[0].mxu0 %v2530_v14  ;;  %1959 = vmatpush3.bf16.msra.mxu1 %v2248_v23 }
  0x6b   :  { %1932 = vmatprep.mubr.bf16.mxu0 %v2532_v15  ;;  %1977 = vmatpush3.bf16.msra.mxu0 %v2249_v24 }
  0x6c   :  { %1978 = vmatprep.subr.bf16.mxu0 %v2250_v25 }
  0x6f   :  { %1979 = vmatpush3.bf16.msra.mxu0 %v2250_v25 }
  0x70   :  { %1980 = vmatprep.subr.bf16.mxu0 %v2251_v26 }
  0x72   :  { %1933 = vmatmul.mubr.bf16.gmra.mrb[4].mxu0 %v2536_v18 }
  0x73   :  { %1936 = vmatprep.mubr.bf16.mxu0 %v2538_v19  ;;  %1981 = vmatpush3.bf16.msra.mxu0 %v2251_v26 }
  0x74   :  { %1982 = vmatprep.subr.bf16.mxu0 %v2252_v27 }
  0x77   :  { %1983 = vmatpush3.bf16.msra.mxu0 %v2252_v27 }
  0x78   :  { %1984 = vmatprep.subr.bf16.mxu0 %v2253_v28 }
  0x7a   :  { %1937 = vmatmul.mubr.bf16.gmra.mrb[8].mxu0 %v2542_v20 }
  0x7b   :  { %1940 = vmatprep.mubr.bf16.mxu0 %v2544_v21  ;;  %1985 = vmatpush3.bf16.msra.mxu0 %v2253_v28 }
  0x7c   :  { %1986 = vmatprep.subr.bf16.mxu0 %v2254_v29 }
  0x7f   :  { %1987 = vmatpush3.bf16.msra.mxu0 %v2254_v29 }
  0x80   :  { %1988 = vmatprep.subr.bf16.mxu0 %v2255_v54 }
  0x82   :  { %1941 = vmatmul.mubr.bf16.gmra.mrb[12].mxu0 %v2548_v22 }
  0x83   :  { %1989 = vmatpush3.bf16.msra.mxu0 %v2255_v54 }
  0x84   :  { %1990 = vmatprep.subr.bf16.mxu0 %v2256_v55 }
  0x87   :  { %1991 = vmatpush3.bf16.msra.mxu0 %v2256_v55 }
 0x13d   :  { %v1930_v30 = vpop.f32.mrb[0].mxu0 }
 0x13e   :  { %v242_v31 = vpop.f32.mrb[1].mxu0 }
 0x13f   :  { %v1931_v32 = vpop.f32.mrb[2].mxu0 }
 0x140   :  { %v306_v33 = vpack.c.bf16 %v1931_v32, %v1930_v30  ;;  %v245_v34 = vpop.f32.mrb[3].mxu0 }
 0x141   :  { %v305_v35 = vpack.c.bf16 %v245_v34, %v242_v31 }
 0x143   :  { %1960 = vmatprep.mubr.bf16.mxu1 %v305_v35 }
 0x144   :  { %1961 = vmatmul.mubr.bf16.vlgmr.msra.gmra.mrb[0].mxu1 %v306_v33 }
 0x145   :  { %v1934_v36 = vpop.f32.mrb[4].mxu0 }
 0x146   :  { %v258_v37 = vpop.f32.mrb[5].mxu0 }
 0x147   :  { %v1935_v38 = vpop.f32.mrb[6].mxu0 }
 0x148   :  { %v308_v39 = vpack.c.bf16 %v1935_v38, %v1934_v36  ;;  %v261_v40 = vpop.f32.mrb[7].mxu0 }
 0x149   :  { %v307_v41 = vpack.c.bf16 %v261_v40, %v258_v37 }
 0x14b   :  { %1964 = vmatprep.mubr.bf16.mxu1 %v307_v41 }
 0x14c   :  { %1965 = vmatmul.mubr.bf16.gmra.mrb[4].mxu1 %v308_v39 }
 0x14d   :  { %v1938_v42 = vpop.f32.mrb[8].mxu0 }
 0x14e   :  { %v274_v43 = vpop.f32.mrb[9].mxu0 }
 0x14f   :  { %v1939_v44 = vpop.f32.mrb[10].mxu0 }
 0x150   :  { %v310_v45 = vpack.c.bf16 %v1939_v44, %v1938_v42  ;;  %v277_v46 = vpop.f32.mrb[11].mxu0 }
 0x151   :  { %v309_v47 = vpack.c.bf16 %v277_v46, %v274_v43 }
 0x153   :  { %1968 = vmatprep.mubr.bf16.mxu1 %v309_v47 }
 0x154   :  { %1969 = vmatmul.mubr.bf16.gmra.mrb[8].mxu1 %v310_v45 }
 0x155   :  { %v1942_v48 = vpop.f32.mrb[12].mxu0 }
 0x156   :  { %v290_v49 = vpop.f32.mrb[13].mxu0 }
 0x157   :  { %v1943_v50 = vpop.f32.mrb[14].mxu0 }
 0x158   :  { %v312_v51 = vpack.c.bf16 %v1943_v50, %v1942_v48  ;;  %v293_v52 = vpop.f32.mrb[15].mxu0 }
 0x159   :  { %v311_v53 = vpack.c.bf16 %v293_v52, %v290_v49 }
 0x15b   :  { %1972 = vmatprep.mubr.bf16.mxu1 %v311_v53 }
 0x15c   :  { %1973 = vmatmul.mubr.bf16.gmra.mrb[12].mxu1 %v312_v51 }
 0x15d   :  { %2024 = vmatprep.mubr.bf16.mxu1 %v2527_v4 }
 0x217   :  { %v1962_v57 = vpop.f32.mrb[0].mxu1 }
 0x218   :  { %v427_v58 = vadd.f32 %v1962_v57, %v1710_v56  ;;  %v418_v59 = vpop.f32.mrb[1].mxu1 }
 0x219   :  { %v419_v60 = vadd.f32 %v1710_v56, %v418_v59  ;;  %v1963_v61 = vpop.f32.mrb[2].mxu1  ;;  %v2258_v59 = vld [vmem:[#allocation7 + $0x48] sm:$0xff]  }
 0x21a   :  { %v430_v62 = vadd.f32 %v1963_v61, %v1710_v56  ;;  %v421_v63 = vpop.f32.mrb[3].mxu1  ;;  %v483_v1 = vmax.f32 %v427_v58, 0.0  ;;  %v2257_v58 = vld [vmem:[#allocation7 + $0x40] sm:$0xff]   ;;  %v2260_v61 = vld [vmem:[#allocation7 + $0x58] sm:$0xff]  }
 0x21b   :  { %v422_v0 = vadd.f32 %v1710_v56, %v421_v63  ;;  %v481_v3 = vmax.f32 %v419_v60, 0.0  ;;  %2040 = vmatprep.subr.bf16.mxu0 %v2257_v58  ;;  %v2259_v60 = vld [vmem:[#allocation7 + $0x50] sm:$0xff]  }
 0x21c   :  { %v484_v2 = vmax.f32 %v430_v62, 0.0  ;;  %v2262_v62 = vld [vmem:[#allocation7 + $0x68] sm:$0xff]   ;;  %v2263_v63 = vld [vmem:[#allocation7 + $0x70] sm:$0xff]  }
 0x21d   :  { %v482_v5 = vmax.f32 %v422_v0, 0.0  ;;  %v1719_v0 = vld [vmem:[%s2600_s5] ss:$0 sm:$0xff] }
 0x21e   :  { %v498_v6 = vpack.c.bf16 %v484_v2, %v483_v1 }
 0x21f   :  { %v497_v7 = vpack.c.bf16 %v482_v5, %v481_v3  ;;  %v1966_v8 = vpop.f32.mrb[4].mxu1 }
 0x220   :  { %v443_v9 = vadd.f32 %v1966_v8, %v1710_v56  ;;  %v434_v10 = vpop.f32.mrb[5].mxu1 }
 0x221   :  { %v435_v11 = vadd.f32 %v1710_v56, %v434_v10  ;;  %v1967_v12 = vpop.f32.mrb[6].mxu1  ;;  %1992 = vmatprep.mubr.bf16.mxu0 %v497_v7 }
 0x222   :  { %v446_v13 = vadd.f32 %v1967_v12, %v1710_v56  ;;  %v437_v16 = vpop.f32.mrb[7].mxu1  ;;  %1993 = vmatmul.mubr.bf16.vlgmr.msra.gmra.mrb[16].mxu0 %v498_v6  ;;  %v487_v23 = vmax.f32 %v443_v9, 0.0 }
 0x223   :  { %v438_v17 = vadd.f32 %v1710_v56, %v437_v16  ;;  %v485_v25 = vmax.f32 %v435_v11, 0.0  ;;  %2041 = vmatpush3.bf16.msra.mxu0 %v2257_v58 }
 0x224   :  { %v488_v24 = vmax.f32 %v446_v13, 0.0  ;;  %2042 = vmatprep.subr.bf16.mxu0 %v2258_v59 }
 0x225   :  { %v486_v26 = vmax.f32 %v438_v17, 0.0 }
 0x226   :  { %v500_v27 = vpack.c.bf16 %v488_v24, %v487_v23 }
 0x227   :  { %v499_v28 = vpack.c.bf16 %v486_v26, %v485_v25  ;;  %v1970_v29 = vpop.f32.mrb[8].mxu1  ;;  %2043 = vmatpush3.bf16.msra.mxu0 %v2258_v59 }
 0x228   :  { %v459_v30 = vadd.f32 %v1970_v29, %v1710_v56  ;;  %v450_v31 = vpop.f32.mrb[9].mxu1  ;;  %2044 = vmatprep.subr.bf16.mxu0 %v2259_v60 }
 0x229   :  { %v451_v32 = vadd.f32 %v1710_v56, %v450_v31  ;;  %v1971_v33 = vpop.f32.mrb[10].mxu1  ;;  %1996 = vmatprep.mubr.bf16.mxu0 %v499_v28 }
 0x22a   :  { %v462_v34 = vadd.f32 %v1971_v33, %v1710_v56  ;;  %v453_v35 = vpop.f32.mrb[11].mxu1  ;;  %1997 = vmatmul.mubr.bf16.gmra.mrb[20].mxu0 %v500_v27  ;;  %v491_v37 = vmax.f32 %v459_v30, 0.0 }
 0x22b   :  { %v454_v36 = vadd.f32 %v1710_v56, %v453_v35  ;;  %v489_v39 = vmax.f32 %v451_v32, 0.0  ;;  %2045 = vmatpush3.bf16.msra.mxu0 %v2259_v60 }
 0x22c   :  { %v492_v38 = vmax.f32 %v462_v34, 0.0  ;;  %2046 = vmatprep.subr.bf16.mxu0 %v2260_v61 }
 0x22d   :  { %v490_v40 = vmax.f32 %v454_v36, 0.0 }
 0x22e   :  { %v502_v41 = vpack.c.bf16 %v492_v38, %v491_v37 }
 0x22f   :  { %v501_v42 = vpack.c.bf16 %v490_v40, %v489_v39  ;;  %v1974_v43 = vpop.f32.mrb[12].mxu1  ;;  %2047 = vmatpush3.bf16.msra.mxu0 %v2260_v61 }
 0x230   :  { %v475_v44 = vadd.f32 %v1974_v43, %v1710_v56  ;;  %v466_v45 = vpop.f32.mrb[13].mxu1 }
 0x231   :  { %v467_v46 = vadd.f32 %v1710_v56, %v466_v45  ;;  %v1975_v47 = vpop.f32.mrb[14].mxu1  ;;  %2000 = vmatprep.mubr.bf16.mxu0 %v501_v42 }
 0x232   :  { %v478_v48 = vadd.f32 %v1975_v47, %v1710_v56  ;;  %v469_v49 = vpop.f32.mrb[15].mxu1  ;;  %2001 = vmatmul.mubr.bf16.gmra.mrb[24].mxu0 %v502_v41  ;;  %v495_v51 = vmax.f32 %v475_v44, 0.0 }
 0x233   :  { %v470_v50 = vadd.f32 %v1710_v56, %v469_v49  ;;  %v493_v53 = vmax.f32 %v467_v46, 0.0  ;;  %v2261_v56 = vld [vmem:[#allocation7 + $0x60] sm:$0xff]  }
 0x234   :  { %v496_v52 = vmax.f32 %v478_v48, 0.0  ;;  %2048 = vmatprep.subr.bf16.mxu0 %v2261_v56 }
 0x235   :  { %v494_v54 = vmax.f32 %v470_v50, 0.0  ;;  %2049 = vmatpush3.bf16.msra.mxu0 %v2261_v56 }
 0x236   :  { %v504_v55 = vpack.c.bf16 %v496_v52, %v495_v51  ;;  %2050 = vmatprep.subr.bf16.mxu0 %v2262_v62 }
 0x237   :  { %v503_v57 = vpack.c.bf16 %v494_v54, %v493_v53 }
 0x239   :  { %2004 = vmatprep.mubr.bf16.mxu0 %v503_v57  ;;  %2051 = vmatpush3.bf16.msra.mxu0 %v2262_v62 }
 0x23a   :  { %2005 = vmatmul.mubr.bf16.gmra.mrb[28].mxu0 %v504_v55  ;;  %2052 = vmatprep.subr.bf16.mxu0 %v2263_v63 }
 0x23d   :  { %2053 = vmatpush3.bf16.msra.mxu0 %v2263_v63 }
 0x2f5   :  { %v1994_v1 = vpop.f32.mrb[16].mxu0 }
 0x2f6   :  { %v619_v2 = vadd.f32 %v1994_v1, %v1719_v0  ;;  %v610_v3 = vpop.f32.mrb[17].mxu0 }
 0x2f7   :  { %v611_v5 = vadd.f32 %v1719_v0, %v610_v3  ;;  %v1995_v6 = vpop.f32.mrb[18].mxu0  ;;  %v2266_v3 = vld [vmem:[#allocation8 + $0x48] sm:$0xff]  }
 0x2f8   :  { %v622_v7 = vadd.f32 %v1995_v6, %v1719_v0  ;;  %v613_v8 = vpop.f32.mrb[19].mxu0  ;;  %v675_v10 = vmax.f32 %v619_v2, 0.0  ;;  %v2265_v2 = vld [vmem:[#allocation8 + $0x40] sm:$0xff]   ;;  %v2270_v6 = vld [vmem:[#allocation8 + $0x68] sm:$0xff]  }
 0x2f9   :  { %v614_v9 = vadd.f32 %v1719_v0, %v613_v8  ;;  %v673_v12 = vmax.f32 %v611_v5, 0.0  ;;  %v2269_v5 = vld [vmem:[#allocation8 + $0x60] sm:$0xff]  }
 0x2fa   :  { %v676_v11 = vmax.f32 %v622_v7, 0.0 }
 0x2fb   :  { %v674_v13 = vmax.f32 %v614_v9, 0.0 }
 0x2fc   :  { %v690_v16 = vpack.c.bf16 %v676_v11, %v675_v10 }
 0x2fd   :  { %v689_v17 = vpack.c.bf16 %v674_v13, %v673_v12  ;;  %v1998_v23 = vpop.f32.mrb[20].mxu0 }
 0x2fe   :  { %v635_v24 = vadd.f32 %v1998_v23, %v1719_v0  ;;  %v626_v25 = vpop.f32.mrb[21].mxu0 }
 0x2ff   :  { %v627_v26 = vadd.f32 %v1719_v0, %v626_v25  ;;  %v1999_v27 = vpop.f32.mrb[22].mxu0  ;;  %2008 = vmatprep.subr.bf16.mxu1 %v689_v17 }
 0x300   :  { %v638_v28 = vadd.f32 %v1999_v27, %v1719_v0  ;;  %v629_v29 = vpop.f32.mrb[23].mxu0  ;;  %2009 = vmatpush3.bf16.msra.mxu1 %v689_v17  ;;  %v679_v31 = vmax.f32 %v635_v24, 0.0 }
 0x301   :  { %v630_v30 = vadd.f32 %v1719_v0, %v629_v29  ;;  %2010 = vmatprep.subr.bf16.mxu1 %v690_v16  ;;  %v677_v33 = vmax.f32 %v627_v26, 0.0 }
 0x302   :  { %v680_v32 = vmax.f32 %v638_v28, 0.0 }
 0x303   :  { %v678_v34 = vmax.f32 %v630_v30, 0.0 }
 0x304   :  { %v692_v35 = vpack.c.bf16 %v680_v32, %v679_v31  ;;  %2011 = vmatpush3.bf16.msra.mxu1 %v690_v16 }
 0x305   :  { %v691_v36 = vpack.c.bf16 %v678_v34, %v677_v33  ;;  %v2002_v37 = vpop.f32.mrb[24].mxu0 }
 0x306   :  { %v651_v38 = vadd.f32 %v2002_v37, %v1719_v0  ;;  %v642_v39 = vpop.f32.mrb[25].mxu0 }
 0x307   :  { %v643_v40 = vadd.f32 %v1719_v0, %v642_v39  ;;  %v2003_v41 = vpop.f32.mrb[26].mxu0  ;;  %2012 = vmatprep.subr.bf16.mxu1 %v691_v36  ;;  %v2272_v39 = vld [vmem:[#allocation8 + $0x78] sm:$0xff]  }
 0x308   :  { %v654_v42 = vadd.f32 %v2003_v41, %v1719_v0  ;;  %v645_v43 = vpop.f32.mrb[27].mxu0  ;;  %2013 = vmatpush3.bf16.msra.mxu1 %v691_v36  ;;  %v683_v45 = vmax.f32 %v651_v38, 0.0  ;;  %v2271_v38 = vld [vmem:[#allocation8 + $0x70] sm:$0xff]  }
 0x309   :  { %v646_v44 = vadd.f32 %v1719_v0, %v645_v43  ;;  %2014 = vmatprep.subr.bf16.mxu1 %v692_v35  ;;  %v681_v47 = vmax.f32 %v643_v40, 0.0  ;;  %v1729_v40 = vld [vmem:[%s2598_s3 + $0x1] ss:$0 sm:$0xff] }
 0x30a   :  { %v684_v46 = vmax.f32 %v654_v42, 0.0 }
 0x30b   :  { %v682_v48 = vmax.f32 %v646_v44, 0.0 }
 0x30c   :  { %v694_v49 = vpack.c.bf16 %v684_v46, %v683_v45  ;;  %2015 = vmatpush3.bf16.msra.mxu1 %v692_v35 }
 0x30d   :  { %v693_v50 = vpack.c.bf16 %v682_v48, %v681_v47  ;;  %v2006_v51 = vpop.f32.mrb[28].mxu0 }
 0x30e   :  { %v667_v52 = vadd.f32 %v2006_v51, %v1719_v0  ;;  %v658_v53 = vpop.f32.mrb[29].mxu0 }
 0x30f   :  { %v659_v54 = vadd.f32 %v1719_v0, %v658_v53  ;;  %v2007_v55 = vpop.f32.mrb[30].mxu0  ;;  %2016 = vmatprep.subr.bf16.mxu1 %v693_v50 }
 0x310   :  { %v670_v57 = vadd.f32 %v2007_v55, %v1719_v0  ;;  %v661_v58 = vpop.f32.mrb[31].mxu0  ;;  %2017 = vmatpush3.bf16.msra.mxu1 %v693_v50  ;;  %v687_v60 = vmax.f32 %v667_v52, 0.0 }
 0x311   :  { %v662_v59 = vadd.f32 %v1719_v0, %v661_v58  ;;  %2018 = vmatprep.subr.bf16.mxu1 %v694_v49  ;;  %v685_v56 = vmax.f32 %v659_v54, 0.0  ;;  %v2264_v0 = vld [vmem:[#allocation7 + $0x78] sm:$0xff]  }
 0x312   :  { %v688_v61 = vmax.f32 %v670_v57, 0.0  ;;  %2054 = vmatprep.subr.bf16.mxu0 %v2264_v0 }
 0x313   :  { %v686_v62 = vmax.f32 %v662_v59, 0.0  ;;  %2055 = vmatpush3.bf16.msra.mxu0 %v2264_v0 }
 0x314   :  { %v696_v63 = vpack.c.bf16 %v688_v61, %v687_v60  ;;  %2019 = vmatpush3.bf16.msra.mxu1 %v694_v49 }
 0x315   :  { %v695_v1 = vpack.c.bf16 %v686_v62, %v685_v56 }
 0x317   :  { %2020 = vmatprep.subr.bf16.mxu1 %v695_v1 }
 0x318   :  { %2021 = vmatpush3.bf16.msra.mxu1 %v695_v1 }
 0x319   :  { %2022 = vmatprep.subr.bf16.mxu1 %v696_v63 }
 0x31c   :  { %2023 = vmatpush3.bf16.msra.mxu1 %v696_v63 }
 0x31d   :  { %2072 = vmatprep.subr.bf16.mxu1 %v2265_v2 }
 0x31f   :  { %2025 = vmatmul.mubr.bf16.vlgmr.msra.gmra.mrb[16].mxu1 %v2530_v14  ;;  %v2267_v14 = vld [vmem:[#allocation8 + $0x50] sm:$0xff]  }
 0x320   :  { %2028 = vmatprep.mubr.bf16.mxu1 %v2532_v15  ;;  %2073 = vmatpush3.bf16.msra.mxu1 %v2265_v2  ;;  %v2268_v15 = vld [vmem:[#allocation8 + $0x58] sm:$0xff]  }
 0x321   :  { %2074 = vmatprep.subr.bf16.mxu1 %v2266_v3 }
 0x324   :  { %2075 = vmatpush3.bf16.msra.mxu1 %v2266_v3 }
 0x325   :  { %2076 = vmatprep.subr.bf16.mxu1 %v2267_v14 }
 0x327   :  { %2029 = vmatmul.mubr.bf16.gmra.mrb[20].mxu1 %v2536_v18 }
 0x328   :  { %2032 = vmatprep.mubr.bf16.mxu1 %v2538_v19  ;;  %2077 = vmatpush3.bf16.msra.mxu1 %v2267_v14 }
 0x329   :  { %2078 = vmatprep.subr.bf16.mxu1 %v2268_v15 }
 0x32c   :  { %2079 = vmatpush3.bf16.msra.mxu1 %v2268_v15 }
 0x32d   :  { %2080 = vmatprep.subr.bf16.mxu1 %v2269_v5 }
 0x32f   :  { %2033 = vmatmul.mubr.bf16.gmra.mrb[24].mxu1 %v2542_v20 }
 0x330   :  { %2036 = vmatprep.mubr.bf16.mxu1 %v2544_v21  ;;  %2081 = vmatpush3.bf16.msra.mxu1 %v2269_v5 }
 0x331   :  { %2082 = vmatprep.subr.bf16.mxu1 %v2270_v6 }
 0x334   :  { %2083 = vmatpush3.bf16.msra.mxu1 %v2270_v6 }
 0x335   :  { %2084 = vmatprep.subr.bf16.mxu1 %v2271_v38 }
 0x337   :  { %2037 = vmatmul.mubr.bf16.gmra.mrb[28].mxu1 %v2548_v22 }
 0x338   :  { %2085 = vmatpush3.bf16.msra.mxu1 %v2271_v38  ;;  %v2273_v38 = vld [vmem:[#allocation7 + $0x80] sm:$0xff]  }
 0x339   :  { %2086 = vmatprep.subr.bf16.mxu1 %v2272_v39 }
 0x33c   :  { %2087 = vmatpush3.bf16.msra.mxu1 %v2272_v39  ;;  %v2274_v39 = vld [vmem:[#allocation7 + $0x88] sm:$0xff]  }
 0x33d   :  { %2136 = vmatprep.subr.bf16.mxu1 %v2273_v38 }
 0x3f2   :  { %v2026_v7 = vpop.f32.mrb[16].mxu1 }
 0x3f3   :  { %v731_v8 = vpop.f32.mrb[17].mxu1 }
 0x3f4   :  { %v2027_v9 = vpop.f32.mrb[18].mxu1 }
 0x3f5   :  { %v795_v10 = vpack.c.bf16 %v2027_v9, %v2026_v7  ;;  %v734_v11 = vpop.f32.mrb[19].mxu1 }
 0x3f6   :  { %v794_v12 = vpack.c.bf16 %v734_v11, %v731_v8 }
 0x3f8   :  { %2056 = vmatprep.mubr.bf16.mxu0 %v794_v12 }
 0x3f9   :  { %2057 = vmatmul.mubr.bf16.vlgmr.msra.gmra.mrb[32].mxu0 %v795_v10 }
 0x3fa   :  { %v2030_v13 = vpop.f32.mrb[20].mxu1 }
 0x3fb   :  { %v747_v16 = vpop.f32.mrb[21].mxu1 }
 0x3fc   :  { %v2031_v17 = vpop.f32.mrb[22].mxu1 }
 0x3fd   :  { %v797_v23 = vpack.c.bf16 %v2031_v17, %v2030_v13  ;;  %v750_v24 = vpop.f32.mrb[23].mxu1 }
 0x3fe   :  { %v796_v25 = vpack.c.bf16 %v750_v24, %v747_v16 }
 0x400   :  { %2060 = vmatprep.mubr.bf16.mxu0 %v796_v25 }
 0x401   :  { %2061 = vmatmul.mubr.bf16.gmra.mrb[36].mxu0 %v797_v23 }
 0x402   :  { %v2034_v26 = vpop.f32.mrb[24].mxu1 }
 0x403   :  { %v763_v27 = vpop.f32.mrb[25].mxu1 }
 0x404   :  { %v2035_v28 = vpop.f32.mrb[26].mxu1 }
 0x405   :  { %v799_v29 = vpack.c.bf16 %v2035_v28, %v2034_v26  ;;  %v766_v30 = vpop.f32.mrb[27].mxu1 }
 0x406   :  { %v798_v31 = vpack.c.bf16 %v766_v30, %v763_v27 }
 0x408   :  { %2064 = vmatprep.mubr.bf16.mxu0 %v798_v31 }
 0x409   :  { %2065 = vmatmul.mubr.bf16.gmra.mrb[40].mxu0 %v799_v29 }
 0x40a   :  { %v2038_v32 = vpop.f32.mrb[28].mxu1 }
 0x40b   :  { %v779_v33 = vpop.f32.mrb[29].mxu1 }
 0x40c   :  { %v2039_v34 = vpop.f32.mrb[30].mxu1 }
 0x40d   :  { %v801_v35 = vpack.c.bf16 %v2039_v34, %v2038_v32  ;;  %v782_v36 = vpop.f32.mrb[31].mxu1 }
 0x40e   :  { %v800_v37 = vpack.c.bf16 %v782_v36, %v779_v33 }
 0x410   :  { %2068 = vmatprep.mubr.bf16.mxu0 %v800_v37 }
 0x411   :  { %2069 = vmatmul.mubr.bf16.gmra.mrb[44].mxu0 %v801_v35 }
 0x412   :  { %2120 = vmatprep.mubr.bf16.mxu0 %v2527_v4 }
 0x4cc   :  { %v2058_v41 = vpop.f32.mrb[32].mxu0 }
 0x4cd   :  { %v918_v42 = vadd.f32 %v2058_v41, %v1729_v40  ;;  %v909_v43 = vpop.f32.mrb[33].mxu0  ;;  %v2275_v41 = vld [vmem:[#allocation7 + $0x90] sm:$0xff]  }
 0x4ce   :  { %v910_v44 = vadd.f32 %v1729_v40, %v909_v43  ;;  %v2059_v45 = vpop.f32.mrb[34].mxu0  ;;  %v2278_v43 = vld [vmem:[#allocation7 + $0xa8] sm:$0xff]  }
 0x4cf   :  { %v921_v46 = vadd.f32 %v2059_v45, %v1729_v40  ;;  %v912_v47 = vpop.f32.mrb[35].mxu0  ;;  %v974_v49 = vmax.f32 %v918_v42, 0.0  ;;  %v2276_v42 = vld [vmem:[#allocation7 + $0x98] sm:$0xff]   ;;  %v1739_v45 = vld [vmem:[%s2600_s5 + $0x1] ss:$0 sm:$0xff] }
 0x4d0   :  { %v913_v48 = vadd.f32 %v1729_v40, %v912_v47  ;;  %v972_v50 = vmax.f32 %v910_v44, 0.0  ;;  %v2279_v44 = vld [vmem:[#allocation7 + $0xb0] sm:$0xff]  }
 0x4d1   :  { %v975_v4 = vmax.f32 %v921_v46, 0.0 }
 0x4d2   :  { %v973_v51 = vmax.f32 %v913_v48, 0.0 }
 0x4d3   :  { %v989_v52 = vpack.c.bf16 %v975_v4, %v974_v49 }
 0x4d4   :  { %v988_v53 = vpack.c.bf16 %v973_v51, %v972_v50  ;;  %v2062_v54 = vpop.f32.mrb[36].mxu0 }
 0x4d5   :  { %v934_v55 = vadd.f32 %v2062_v54, %v1729_v40  ;;  %v925_v57 = vpop.f32.mrb[37].mxu0 }
 0x4d6   :  { %v926_v58 = vadd.f32 %v1729_v40, %v925_v57  ;;  %v2063_v59 = vpop.f32.mrb[38].mxu0  ;;  %2088 = vmatprep.mubr.bf16.mxu1 %v988_v53 }
 0x4d7   :  { %v937_v60 = vadd.f32 %v2063_v59, %v1729_v40  ;;  %v928_v61 = vpop.f32.mrb[39].mxu0  ;;  %2089 = vmatmul.mubr.bf16.vlgmr.msra.gmra.mrb[32].mxu1 %v989_v52  ;;  %v978_v62 = vmax.f32 %v934_v55, 0.0 }
 0x4d8   :  { %v929_v56 = vadd.f32 %v1729_v40, %v928_v61  ;;  %v976_v1 = vmax.f32 %v926_v58, 0.0  ;;  %2137 = vmatpush3.bf16.msra.mxu1 %v2273_v38 }
 0x4d9   :  { %v979_v63 = vmax.f32 %v937_v60, 0.0  ;;  %2138 = vmatprep.subr.bf16.mxu1 %v2274_v39 }
 0x4da   :  { %v977_v0 = vmax.f32 %v929_v56, 0.0 }
 0x4db   :  { %v991_v2 = vpack.c.bf16 %v979_v63, %v978_v62 }
 0x4dc   :  { %v990_v3 = vpack.c.bf16 %v977_v0, %v976_v1  ;;  %v2066_v14 = vpop.f32.mrb[40].mxu0  ;;  %2139 = vmatpush3.bf16.msra.mxu1 %v2274_v39 }
 0x4dd   :  { %v950_v15 = vadd.f32 %v2066_v14, %v1729_v40  ;;  %v941_v5 = vpop.f32.mrb[41].mxu0  ;;  %2140 = vmatprep.subr.bf16.mxu1 %v2275_v41 }
 0x4de   :  { %v942_v6 = vadd.f32 %v1729_v40, %v941_v5  ;;  %v2067_v7 = vpop.f32.mrb[42].mxu0  ;;  %2092 = vmatprep.mubr.bf16.mxu1 %v990_v3 }
 0x4df   :  { %v953_v8 = vadd.f32 %v2067_v7, %v1729_v40  ;;  %v944_v9 = vpop.f32.mrb[43].mxu0  ;;  %2093 = vmatmul.mubr.bf16.gmra.mrb[36].mxu1 %v991_v2  ;;  %v982_v11 = vmax.f32 %v950_v15, 0.0 }
 0x4e0   :  { %v945_v10 = vadd.f32 %v1729_v40, %v944_v9  ;;  %v980_v13 = vmax.f32 %v942_v6, 0.0  ;;  %2141 = vmatpush3.bf16.msra.mxu1 %v2275_v41 }
 0x4e1   :  { %v983_v12 = vmax.f32 %v953_v8, 0.0  ;;  %2142 = vmatprep.subr.bf16.mxu1 %v2276_v42 }
 0x4e2   :  { %v981_v16 = vmax.f32 %v945_v10, 0.0 }
 0x4e3   :  { %v993_v17 = vpack.c.bf16 %v983_v12, %v982_v11 }
 0x4e4   :  { %v992_v23 = vpack.c.bf16 %v981_v16, %v980_v13  ;;  %v2070_v24 = vpop.f32.mrb[44].mxu0  ;;  %2143 = vmatpush3.bf16.msra.mxu1 %v2276_v42 }
 0x4e5   :  { %v966_v25 = vadd.f32 %v2070_v24, %v1729_v40  ;;  %v957_v26 = vpop.f32.mrb[45].mxu0 }
 0x4e6   :  { %v958_v27 = vadd.f32 %v1729_v40, %v957_v26  ;;  %v2071_v28 = vpop.f32.mrb[46].mxu0  ;;  %2096 = vmatprep.mubr.bf16.mxu1 %v992_v23 }
 0x4e7   :  { %v969_v29 = vadd.f32 %v2071_v28, %v1729_v40  ;;  %v960_v30 = vpop.f32.mrb[47].mxu0  ;;  %2097 = vmatmul.mubr.bf16.gmra.mrb[40].mxu1 %v993_v17  ;;  %v986_v32 = vmax.f32 %v966_v25, 0.0 }
 0x4e8   :  { %v961_v31 = vadd.f32 %v1729_v40, %v960_v30  ;;  %v984_v34 = vmax.f32 %v958_v27, 0.0  ;;  %v2277_v40 = vld [vmem:[#allocation7 + $0xa0] sm:$0xff]  }
 0x4e9   :  { %v987_v33 = vmax.f32 %v969_v29, 0.0  ;;  %2144 = vmatprep.subr.bf16.mxu1 %v2277_v40 }
 0x4ea   :  { %v985_v35 = vmax.f32 %v961_v31, 0.0  ;;  %2145 = vmatpush3.bf16.msra.mxu1 %v2277_v40 }
 0x4eb   :  { %v995_v36 = vpack.c.bf16 %v987_v33, %v986_v32  ;;  %2146 = vmatprep.subr.bf16.mxu1 %v2278_v43 }
 0x4ec   :  { %v994_v37 = vpack.c.bf16 %v985_v35, %v984_v34 }
 0x4ee   :  { %2100 = vmatprep.mubr.bf16.mxu1 %v994_v37  ;;  %2147 = vmatpush3.bf16.msra.mxu1 %v2278_v43  ;;  %v2289_v43 = vld [vmem:[#allocation2 + $0x8] sm:$0xff]  }
 0x4ef   :  { %2101 = vmatmul.mubr.bf16.gmra.mrb[44].mxu1 %v995_v36  ;;  %2148 = vmatprep.subr.bf16.mxu1 %v2279_v44 }
 0x4f2   :  { %2149 = vmatpush3.bf16.msra.mxu1 %v2279_v44  ;;  %v2290_v44 = vld [vmem:[#allocation2 + $0x10] sm:$0xff]  }
 0x5aa   :  { %v2090_v46 = vpop.f32.mrb[32].mxu1 }
 0x5ab   :  { %v1112_v47 = vadd.f32 %v2090_v46, %v1739_v45  ;;  %v1103_v48 = vpop.f32.mrb[33].mxu1  ;;  %v2281_v46 = vld [vmem:[#allocation8 + $0x80] sm:$0xff]  }
 0x5ac   :  { %v1104_v49 = vadd.f32 %v1739_v45, %v1103_v48  ;;  %v2091_v4 = vpop.f32.mrb[34].mxu1  ;;  %v2283_v48 = vld [vmem:[#allocation8 + $0x90] sm:$0xff]  }
 0x5ad   :  { %v1115_v50 = vadd.f32 %v2091_v4, %v1739_v45  ;;  %v1106_v51 = vpop.f32.mrb[35].mxu1  ;;  %v1168_v53 = vmax.f32 %v1112_v47, 0.0  ;;  %v2282_v47 = vld [vmem:[#allocation8 + $0x88] sm:$0xff]  }
 0x5ae   :  { %v1107_v52 = vadd.f32 %v1739_v45, %v1106_v51  ;;  %v1166_v55 = vmax.f32 %v1104_v49, 0.0 }
 0x5af   :  { %v1169_v54 = vmax.f32 %v1115_v50, 0.0 }
 0x5b0   :  { %v1167_v57 = vmax.f32 %v1107_v52, 0.0 }
 0x5b1   :  { %v1183_v58 = vpack.c.bf16 %v1169_v54, %v1168_v53 }
 0x5b2   :  { %v1182_v59 = vpack.c.bf16 %v1167_v57, %v1166_v55  ;;  %v2094_v60 = vpop.f32.mrb[36].mxu1 }
 0x5b3   :  { %v1128_v61 = vadd.f32 %v2094_v60, %v1739_v45  ;;  %v1119_v56 = vpop.f32.mrb[37].mxu1 }
 0x5b4   :  { %v1120_v62 = vadd.f32 %v1739_v45, %v1119_v56  ;;  %v2095_v63 = vpop.f32.mrb[38].mxu1  ;;  %2104 = vmatprep.subr.bf16.mxu0 %v1182_v59 }
 0x5b5   :  { %v1131_v1 = vadd.f32 %v2095_v63, %v1739_v45  ;;  %v1122_v0 = vpop.f32.mrb[39].mxu1  ;;  %2105 = vmatpush3.bf16.msra.mxu0 %v1182_v59  ;;  %v1172_v3 = vmax.f32 %v1128_v61, 0.0 }
 0x5b6   :  { %v1123_v2 = vadd.f32 %v1739_v45, %v1122_v0  ;;  %2106 = vmatprep.subr.bf16.mxu0 %v1183_v58  ;;  %v1170_v15 = vmax.f32 %v1120_v62, 0.0 }
 0x5b7   :  { %v1173_v14 = vmax.f32 %v1131_v1, 0.0 }
 0x5b8   :  { %v1171_v5 = vmax.f32 %v1123_v2, 0.0 }
 0x5b9   :  { %v1185_v6 = vpack.c.bf16 %v1173_v14, %v1172_v3  ;;  %2107 = vmatpush3.bf16.msra.mxu0 %v1183_v58 }
 0x5ba   :  { %v1184_v7 = vpack.c.bf16 %v1171_v5, %v1170_v15  ;;  %v2098_v8 = vpop.f32.mrb[40].mxu1  ;;  %v2287_v5 = vld [vmem:[#allocation8 + $0xb0] sm:$0xff]  }
 0x5bb   :  { %v1144_v9 = vadd.f32 %v2098_v8, %v1739_v45  ;;  %v1135_v10 = vpop.f32.mrb[41].mxu1 }
 0x5bc   :  { %v1136_v11 = vadd.f32 %v1739_v45, %v1135_v10  ;;  %v2099_v12 = vpop.f32.mrb[42].mxu1  ;;  %2108 = vmatprep.subr.bf16.mxu0 %v1184_v7 }
 0x5bd   :  { %v1147_v13 = vadd.f32 %v2099_v12, %v1739_v45  ;;  %v1138_v16 = vpop.f32.mrb[43].mxu1  ;;  %2109 = vmatpush3.bf16.msra.mxu0 %v1184_v7  ;;  %v1176_v23 = vmax.f32 %v1144_v9, 0.0  ;;  %v1749_v7 = vld [vmem:[%s2598_s3 + $0x2] ss:$0 sm:$0xff] }
 0x5be   :  { %v1139_v17 = vadd.f32 %v1739_v45, %v1138_v16  ;;  %2110 = vmatprep.subr.bf16.mxu0 %v1185_v6  ;;  %v1174_v25 = vmax.f32 %v1136_v11, 0.0 }
 0x5bf   :  { %v1177_v24 = vmax.f32 %v1147_v13, 0.0 }
 0x5c0   :  { %v1175_v26 = vmax.f32 %v1139_v17, 0.0 }
 0x5c1   :  { %v1187_v27 = vpack.c.bf16 %v1177_v24, %v1176_v23  ;;  %2111 = vmatpush3.bf16.msra.mxu0 %v1185_v6  ;;  %v2288_v6 = vld [vmem:[#allocation8 + $0xb8] sm:$0xff]  }
 0x5c2   :  { %v1186_v28 = vpack.c.bf16 %v1175_v26, %v1174_v25  ;;  %v2102_v29 = vpop.f32.mrb[44].mxu1 }
 0x5c3   :  { %v1160_v30 = vadd.f32 %v2102_v29, %v1739_v45  ;;  %v1151_v31 = vpop.f32.mrb[45].mxu1 }
 0x5c4   :  { %v1152_v32 = vadd.f32 %v1739_v45, %v1151_v31  ;;  %v2103_v33 = vpop.f32.mrb[46].mxu1  ;;  %2112 = vmatprep.subr.bf16.mxu0 %v1186_v28 }
 0x5c5   :  { %v1163_v34 = vadd.f32 %v2103_v33, %v1739_v45  ;;  %v1154_v35 = vpop.f32.mrb[47].mxu1  ;;  %2113 = vmatpush3.bf16.msra.mxu0 %v1186_v28  ;;  %v1180_v37 = vmax.f32 %v1160_v30, 0.0 }
 0x5c6   :  { %v1155_v36 = vadd.f32 %v1739_v45, %v1154_v35  ;;  %2114 = vmatprep.subr.bf16.mxu0 %v1187_v27  ;;  %v1178_v39 = vmax.f32 %v1152_v32, 0.0  ;;  %v2280_v45 = vld [vmem:[#allocation7 + $0xb8] sm:$0xff]  }
 0x5c7   :  { %v1181_v38 = vmax.f32 %v1163_v34, 0.0  ;;  %2150 = vmatprep.subr.bf16.mxu1 %v2280_v45 }
 0x5c8   :  { %v1179_v41 = vmax.f32 %v1155_v36, 0.0  ;;  %2151 = vmatpush3.bf16.msra.mxu1 %v2280_v45 }
 0x5c9   :  { %v1189_v42 = vpack.c.bf16 %v1181_v38, %v1180_v37  ;;  %2115 = vmatpush3.bf16.msra.mxu0 %v1187_v27  ;;  %2200 = vmatprep.subr.bf16.mxu1 %v2281_v46 }
 0x5ca   :  { %v1188_v40 = vpack.c.bf16 %v1179_v41, %v1178_v39 }
 0x5cc   :  { %2116 = vmatprep.subr.bf16.mxu0 %v1188_v40 }
 0x5cd   :  { %2117 = vmatpush3.bf16.msra.mxu0 %v1188_v40 }
 0x5ce   :  { %2118 = vmatprep.subr.bf16.mxu0 %v1189_v42 }
 0x5d1   :  { %2119 = vmatpush3.bf16.msra.mxu0 %v1189_v42 }
 0x5d2   :  { %2168 = vmatprep.subr.bf16.mxu0 %v2281_v46 }
 0x5d4   :  { %2121 = vmatmul.mubr.bf16.vlgmr.msra.gmra.mrb[48].mxu0 %v2289_v43 }
 0x5d5   :  { %2124 = vmatprep.mubr.bf16.mxu0 %v2290_v44  ;;  %2169 = vmatpush3.bf16.msra.mxu0 %v2281_v46 }
 0x5d6   :  { %2170 = vmatprep.subr.bf16.mxu0 %v2282_v47 }
 0x5d9   :  { %2171 = vmatpush3.bf16.msra.mxu0 %v2282_v47 }
 0x5da   :  { %2172 = vmatprep.subr.bf16.mxu0 %v2283_v48 }
 0x5dc   :  { %2125 = vmatmul.mubr.bf16.gmra.mrb[52].mxu0 %v2536_v18  ;;  %v2284_v18 = vld [vmem:[#allocation8 + $0x98] sm:$0xff]  }
 0x5dd   :  { %2128 = vmatprep.mubr.bf16.mxu0 %v2538_v19  ;;  %2173 = vmatpush3.bf16.msra.mxu0 %v2283_v48  ;;  %v2285_v19 = vld [vmem:[#allocation8 + $0xa0] sm:$0xff]  }
 0x5de   :  { %2174 = vmatprep.subr.bf16.mxu0 %v2284_v18 }
 0x5e1   :  { %2175 = vmatpush3.bf16.msra.mxu0 %v2284_v18 }
 0x5e2   :  { %2176 = vmatprep.subr.bf16.mxu0 %v2285_v19 }
 0x5e4   :  { %2129 = vmatmul.mubr.bf16.gmra.mrb[56].mxu0 %v2542_v20  ;;  %v2286_v20 = vld [vmem:[#allocation8 + $0xa8] sm:$0xff]  }
 0x5e5   :  { %2132 = vmatprep.mubr.bf16.mxu0 %v2544_v21  ;;  %2177 = vmatpush3.bf16.msra.mxu0 %v2285_v19 }
 0x5e6   :  { %2178 = vmatprep.subr.bf16.mxu0 %v2286_v20 }
 0x5e9   :  { %2179 = vmatpush3.bf16.msra.mxu0 %v2286_v20 }
 0x5ea   :  { %2180 = vmatprep.subr.bf16.mxu0 %v2287_v5 }
 0x5ec   :  { %2133 = vmatmul.mubr.bf16.gmra.mrb[60].mxu0 %v2548_v22 }
 0x5ed   :  { %2181 = vmatpush3.bf16.msra.mxu0 %v2287_v5 }
 0x5ee   :  { %2182 = vmatprep.subr.bf16.mxu0 %v2288_v6 }
 0x5f1   :  { %2183 = vmatpush3.bf16.msra.mxu0 %v2288_v6 }
 0x6a7   :  { %v2122_v21 = vpop.f32.mrb[48].mxu0 }
 0x6a8   :  { %v1224_v22 = vpop.f32.mrb[49].mxu0 }
 0x6a9   :  { %v2123_v49 = vpop.f32.mrb[50].mxu0 }
 0x6aa   :  { %v1288_v4 = vpack.c.bf16 %v2123_v49, %v2122_v21  ;;  %v1227_v50 = vpop.f32.mrb[51].mxu0 }
 0x6ab   :  { %v1287_v51 = vpack.c.bf16 %v1227_v50, %v1224_v22 }
 0x6ad   :  { %2152 = vmatprep.mubr.bf16.mxu1 %v1287_v51 }
 0x6ae   :  { %2153 = vmatmul.mubr.bf16.vlgmr.msra.gmra.mrb[48].mxu1 %v1288_v4 }
 0x6af   :  { %v2126_v52 = vpop.f32.mrb[52].mxu0  ;;  %2208 = vmatpush3.bf16.msra.mxu1 %v2281_v46 }
 0x6b0   :  { %v1240_v53 = vpop.f32.mrb[53].mxu0  ;;  %2201 = vmatprep.subr.bf16.mxu1 %v2282_v47 }
 0x6b1   :  { %v2127_v54 = vpop.f32.mrb[54].mxu0 }
 0x6b2   :  { %v1290_v55 = vpack.c.bf16 %v2127_v54, %v2126_v52  ;;  %v1243_v57 = vpop.f32.mrb[55].mxu0 }
 0x6b3   :  { %v1289_v58 = vpack.c.bf16 %v1243_v57, %v1240_v53  ;;  %2209 = vmatpush3.bf16.msra.mxu1 %v2282_v47 }
 0x6b4   :  { %2202 = vmatprep.subr.bf16.mxu1 %v2283_v48 }
 0x6b5   :  { %2156 = vmatprep.mubr.bf16.mxu1 %v1289_v58 }
 0x6b6   :  { %2157 = vmatmul.mubr.bf16.gmra.mrb[52].mxu1 %v1290_v55 }
 0x6b7   :  { %v2130_v59 = vpop.f32.mrb[56].mxu0  ;;  %2210 = vmatpush3.bf16.msra.mxu1 %v2283_v48 }
 0x6b8   :  { %v1256_v60 = vpop.f32.mrb[57].mxu0  ;;  %2203 = vmatprep.subr.bf16.mxu1 %v2284_v18 }
 0x6b9   :  { %v2131_v61 = vpop.f32.mrb[58].mxu0 }
 0x6ba   :  { %v1292_v56 = vpack.c.bf16 %v2131_v61, %v2130_v59  ;;  %v1259_v62 = vpop.f32.mrb[59].mxu0 }
 0x6bb   :  { %v1291_v63 = vpack.c.bf16 %v1259_v62, %v1256_v60  ;;  %2211 = vmatpush3.bf16.msra.mxu1 %v2284_v18 }
 0x6bc   :  { %2204 = vmatprep.subr.bf16.mxu1 %v2285_v19 }
 0x6bd   :  { %2160 = vmatprep.mubr.bf16.mxu1 %v1291_v63 }
 0x6be   :  { %2161 = vmatmul.mubr.bf16.gmra.mrb[56].mxu1 %v1292_v56 }
 0x6bf   :  { %v2134_v1 = vpop.f32.mrb[60].mxu0  ;;  %2212 = vmatpush3.bf16.msra.mxu1 %v2285_v19 }
 0x6c0   :  { %v1272_v0 = vpop.f32.mrb[61].mxu0  ;;  %2205 = vmatprep.subr.bf16.mxu1 %v2286_v20 }
 0x6c1   :  { %v2135_v2 = vpop.f32.mrb[62].mxu0 }
 0x6c2   :  { %v1294_v3 = vpack.c.bf16 %v2135_v2, %v2134_v1  ;;  %v1275_v14 = vpop.f32.mrb[63].mxu0 }
 0x6c3   :  { %v1293_v15 = vpack.c.bf16 %v1275_v14, %v1272_v0  ;;  %2213 = vmatpush3.bf16.msra.mxu1 %v2286_v20  ;;  %v1759_v0 = vld [vmem:[%s2600_s5 + $0x2] ss:$0 sm:$0xff]  ;;  %s2415_s5 = smov [#allocation10]  }
 0x6c4   :  { %2206 = vmatprep.subr.bf16.mxu1 %v2287_v5  ;;  %s1680_s30 = sshll.u32 %s2415_s5, 4  ;;  %s1681_s30 = int_to_ptr.vmem [resolvable:$true] %s1680_s30 }
 0x6c5   :  { %2164 = vmatprep.mubr.bf16.mxu1 %v1293_v15  ;;  %s2379_s7 = scalar_lea.vmem %s1681_s30, 2048  ;;  %p2384_p5 = scmp.lt.s32.totalorder %s1681_s30, %s1681_s30 }
 0x6c6   :  { %2165 = vmatmul.mubr.bf16.gmra.mrb[60].mxu1 %v1294_v3  ;;  %p2380_p4 = scmp.ne.s32.totalorder %s1681_s30, %s2379_s7  ;;  %p2385_p6 = scmp.lt.s32.totalorder %s2379_s7, %s2379_s7 }
 0x6c7   :  { %2214 = vmatpush3.bf16.msra.mxu1 %v2287_v5 }
 0x6c8   :  { %2207 = vmatprep.subr.bf16.mxu1 %v2288_v6  ;;  %p2386_p7 = por %p2385_p6, %p2384_p5 }
 0x6ca   :  { %p2387_p8 = pnand %p2386_p7, %p2380_p4 }
 0x6cb   :  { %2215 = vmatpush3.bf16.msra.mxu1 %v2288_v6 }
 0x781   :  { %v2154_v8 = vpop.f32.mrb[48].mxu1 }
 0x782   :  { %v1411_v9 = vadd.f32 %v2154_v8, %v1749_v7  ;;  %v1402_v10 = vpop.f32.mrb[49].mxu1 }
 0x783   :  { %v1403_v11 = vadd.f32 %v1749_v7, %v1402_v10  ;;  %v2155_v12 = vpop.f32.mrb[50].mxu1 }
 0x784   :  { %v1414_v13 = vadd.f32 %v2155_v12, %v1749_v7  ;;  %v1405_v16 = vpop.f32.mrb[51].mxu1  ;;  %v1467_v23 = vmax.f32 %v1411_v9, 0.0 }
 0x785   :  { %v1406_v17 = vadd.f32 %v1749_v7, %v1405_v16  ;;  %v1465_v25 = vmax.f32 %v1403_v11, 0.0 }
 0x786   :  { %v1468_v24 = vmax.f32 %v1414_v13, 0.0 }
 0x787   :  { %v1466_v26 = vmax.f32 %v1406_v17, 0.0 }
 0x788   :  { %v1482_v27 = vpack.c.bf16 %v1468_v24, %v1467_v23 }
 0x789   :  { %v1481_v28 = vpack.c.bf16 %v1466_v26, %v1465_v25  ;;  %v2158_v29 = vpop.f32.mrb[52].mxu1 }
 0x78a   :  { %v1427_v30 = vadd.f32 %v2158_v29, %v1749_v7  ;;  %v1418_v31 = vpop.f32.mrb[53].mxu1 }
 0x78b   :  { %v1419_v32 = vadd.f32 %v1749_v7, %v1418_v31  ;;  %v2159_v33 = vpop.f32.mrb[54].mxu1  ;;  %2184 = vmatprep.mubr.bf16.mxu0 %v1481_v28 }
 0x78c   :  { %v1430_v34 = vadd.f32 %v2159_v33, %v1749_v7  ;;  %v1421_v35 = vpop.f32.mrb[55].mxu1  ;;  %2185 = vmatmul.mubr.bf16.vlgmr.msra.gmra.mrb[64].mxu0 %v1482_v27  ;;  %v1471_v37 = vmax.f32 %v1427_v30, 0.0 }
 0x78d   :  { %v1422_v36 = vadd.f32 %v1749_v7, %v1421_v35  ;;  %v1469_v39 = vmax.f32 %v1419_v32, 0.0 }
 0x78e   :  { %v1472_v38 = vmax.f32 %v1430_v34, 0.0 }
 0x78f   :  { %v1470_v41 = vmax.f32 %v1422_v36, 0.0 }
 0x790   :  { %v1484_v42 = vpack.c.bf16 %v1472_v38, %v1471_v37 }
 0x791   :  { %v1483_v40 = vpack.c.bf16 %v1470_v41, %v1469_v39  ;;  %v2162_v43 = vpop.f32.mrb[56].mxu1 }
 0x792   :  { %v1443_v44 = vadd.f32 %v2162_v43, %v1749_v7  ;;  %v1434_v45 = vpop.f32.mrb[57].mxu1 }
 0x793   :  { %v1435_v46 = vadd.f32 %v1749_v7, %v1434_v45  ;;  %v2163_v47 = vpop.f32.mrb[58].mxu1  ;;  %2188 = vmatprep.mubr.bf16.mxu0 %v1483_v40 }
 0x794   :  { %v1446_v48 = vadd.f32 %v2163_v47, %v1749_v7  ;;  %v1437_v18 = vpop.f32.mrb[59].mxu1  ;;  %2189 = vmatmul.mubr.bf16.gmra.mrb[68].mxu0 %v1484_v42  ;;  %v1475_v20 = vmax.f32 %v1443_v44, 0.0 }
 0x795   :  { %v1438_v19 = vadd.f32 %v1749_v7, %v1437_v18  ;;  %v1473_v22 = vmax.f32 %v1435_v46, 0.0 }
 0x796   :  { %v1476_v21 = vmax.f32 %v1446_v48, 0.0 }
 0x797   :  { %v1474_v49 = vmax.f32 %v1438_v19, 0.0 }
 0x798   :  { %v1486_v4 = vpack.c.bf16 %v1476_v21, %v1475_v20 }
 0x799   :  { %v1485_v50 = vpack.c.bf16 %v1474_v49, %v1473_v22  ;;  %v2166_v51 = vpop.f32.mrb[60].mxu1 }
 0x79a   :  { %v1459_v52 = vadd.f32 %v2166_v51, %v1749_v7  ;;  %v1450_v53 = vpop.f32.mrb[61].mxu1 }
 0x79b   :  { %v1451_v54 = vadd.f32 %v1749_v7, %v1450_v53  ;;  %v2167_v55 = vpop.f32.mrb[62].mxu1  ;;  %2192 = vmatprep.mubr.bf16.mxu1 %v1485_v50 }
 0x79c   :  { %v1462_v57 = vadd.f32 %v2167_v55, %v1749_v7  ;;  %v1453_v58 = vpop.f32.mrb[63].mxu1  ;;  %2193 = vmatmul.mubr.bf16.vlgmr.msra.gmra.mrb[64].mxu1 %v1486_v4  ;;  %v1479_v60 = vmax.f32 %v1459_v52, 0.0 }
 0x79d   :  { %v1454_v59 = vadd.f32 %v1749_v7, %v1453_v58  ;;  %v1477_v56 = vmax.f32 %v1451_v54, 0.0 }
 0x79e   :  { %v1480_v61 = vmax.f32 %v1462_v57, 0.0 }
 0x79f   :  { %v1478_v62 = vmax.f32 %v1454_v59, 0.0 }
 0x7a0   :  { %v1488_v63 = vpack.c.bf16 %v1480_v61, %v1479_v60 }
 0x7a1   :  { %v1487_v1 = vpack.c.bf16 %v1478_v62, %v1477_v56 }
 0x7a3   :  { %2196 = vmatprep.mubr.bf16.mxu1 %v1487_v1 }
 0x7a4   :  { %2197 = vmatmul.mubr.bf16.gmra.mrb[68].mxu1 %v1488_v63 }
 0x85f   :  { %v2186_v2 = vpop.f32.mrb[64].mxu0 }
 0x860   :  { %v1605_v3 = vadd.f32 %v2186_v2, %v1759_v0  ;;  %v1596_v14 = vpop.f32.mrb[65].mxu0 }
 0x861   :  { %v1597_v15 = vadd.f32 %v1759_v0, %v1596_v14  ;;  %v2187_v5 = vpop.f32.mrb[66].mxu0 }
 0x862   :  { %1661 = vst [vmem:[#allocation10 + $0x10] sm:$0xff] %v1605_v3  ;;  %v1608_v6 = vadd.f32 %v2187_v5, %v1759_v0  ;;  %v1599_v7 = vpop.f32.mrb[67].mxu0 }
 0x863   :  { %1659 = vst [vmem:[#allocation10] sm:$0xff] %v1597_v15  ;;  %v1600_v8 = vadd.f32 %v1759_v0, %v1599_v7 }
 0x864   :  { %1662 = vst [vmem:[#allocation10 + $0x18] sm:$0xff] %v1608_v6 }
 0x865   :  { %1660 = vst [vmem:[#allocation10 + $0x8] sm:$0xff] %v1600_v8 }
 0x867   :  { %v2190_v9 = vpop.f32.mrb[68].mxu0 }
 0x868   :  { %v1621_v10 = vadd.f32 %v2190_v9, %v1759_v0  ;;  %v1612_v11 = vpop.f32.mrb[69].mxu0 }
 0x869   :  { %v1613_v12 = vadd.f32 %v1759_v0, %v1612_v11  ;;  %v2191_v13 = vpop.f32.mrb[70].mxu0 }
 0x86a   :  { %1665 = vst [vmem:[#allocation10 + $0x30] sm:$0xff] %v1621_v10  ;;  %v1624_v16 = vadd.f32 %v2191_v13, %v1759_v0  ;;  %v1615_v17 = vpop.f32.mrb[71].mxu0 }
 0x86b   :  { %1663 = vst [vmem:[#allocation10 + $0x20] sm:$0xff] %v1613_v12  ;;  %v1616_v23 = vadd.f32 %v1759_v0, %v1615_v17 }
 0x86c   :  { %1666 = vst [vmem:[#allocation10 + $0x38] sm:$0xff] %v1624_v16 }
 0x86d   :  { %1664 = vst [vmem:[#allocation10 + $0x28] sm:$0xff] %v1616_v23 }
 0x86f   :  { %v2194_v24 = vpop.f32.mrb[64].mxu1 }
 0x870   :  { %v1637_v25 = vadd.f32 %v2194_v24, %v1759_v0  ;;  %v1628_v26 = vpop.f32.mrb[65].mxu1 }
 0x871   :  { %v1629_v27 = vadd.f32 %v1759_v0, %v1628_v26  ;;  %v2195_v28 = vpop.f32.mrb[66].mxu1 }
 0x872   :  { %1669 = vst [vmem:[#allocation10 + $0x50] sm:$0xff] %v1637_v25  ;;  %v1640_v29 = vadd.f32 %v2195_v28, %v1759_v0  ;;  %v1631_v30 = vpop.f32.mrb[67].mxu1 }
 0x873   :  { %1667 = vst [vmem:[#allocation10 + $0x40] sm:$0xff] %v1629_v27  ;;  %v1632_v31 = vadd.f32 %v1759_v0, %v1631_v30 }
 0x874   :  { %1670 = vst [vmem:[#allocation10 + $0x58] sm:$0xff] %v1640_v29 }
 0x875   :  { %1668 = vst [vmem:[#allocation10 + $0x48] sm:$0xff] %v1632_v31 }
 0x877   :  { %v2198_v32 = vpop.f32.mrb[68].mxu1 }
 0x878   :  { %v1653_v33 = vadd.f32 %v2198_v32, %v1759_v0  ;;  %v1644_v34 = vpop.f32.mrb[69].mxu1 }
 0x879   :  { %v1645_v35 = vadd.f32 %v1759_v0, %v1644_v34  ;;  %v2199_v36 = vpop.f32.mrb[70].mxu1 }
 0x87a   :  { %1673 = vst [vmem:[#allocation10 + $0x70] sm:$0xff] %v1653_v33  ;;  %v1656_v37 = vadd.f32 %v2199_v36, %v1759_v0  ;;  %v1647_v38 = vpop.f32.mrb[71].mxu1 }
 0x87b   :  { %1671 = vst [vmem:[#allocation10 + $0x60] sm:$0xff] %v1645_v35  ;;  %v1648_v39 = vadd.f32 %v1759_v0, %v1647_v38 }
 0x87c   :  { %1674 = vst [vmem:[#allocation10 + $0x78] sm:$0xff] %v1656_v37 }
 0x87d   :  { %1672 = vst [vmem:[#allocation10 + $0x68] sm:$0xff] %v1648_v39 }
 0x87e   :  { %2390 = shalt.err (!%p2387_p8)
}
 0x87f   :  { %s2391_s0 = scalar_lea.hbm %s2601_s6, 2048 }
 0x880   :  { %p2392_p9 = scmp.ne.s32.totalorder %s2601_s6, %s2391_s0  ;;  %p2395_p10 = scmp.lt.u32.totalorder %s2391_s0, %s2601_s6 }
 0x882   :  { %p2397_p11 = pnand %p2395_p10, %p2392_p9 }
 0x884   :  { %2400 = shalt.err (!%p2397_p11)
}
 0x885   :  { %s2416_s15 = smov 128   ;;  %s2417_s16 = smov 8  }
 0x886   :  { %1686 = dma.vmem_to_hbm [thread:$0]  %s1681_s30, 2048, %s2601_s6, [#allocation4], %s2416_s15, %s2416_s15, %s2417_s16  }
 0x887   :  { %2407 = dma.done.wait [#allocation4], 2048  }
 0x888   :  { %2408 = vsyncadd [#allocation4], 4294965248 }
 0x889   :  { %1690 = vsyncpa [#allocation3], 1 }
 0x88a   :  { %1691 = vsyncpa [#allocation6], 1 }
 0x88b   :  { %1692 = vsyncpa [#allocation9], 1 }
 0x88c   :  { %1693 = vsyncpa [#allocation4], 1 }

</bundles_post_ra>
